<compile_context>
chip_gen: v6e
topology: v6e:2x2x1
jax: 0.10.0
libtpu: 0.0.40
codegen_flags: <defaults>
</compile_context>

<pallas_src>
import numpy as np
import jax
import jax.numpy as jnp
from jax.experimental import pallas as pl
from jax.experimental.pallas import tpu as pltpu

jax.config.update("jax_default_matmul_precision", "highest")

# ---------------- configuration (small shapes) ----------------
IN_DIM, HID_DIM, OUT_DIM = 16, 32, 8                        # target MLP
BATCH = 8
N_W1 = HID_DIM * IN_DIM                                     # 512
N_B1 = HID_DIM                                              # 32
N_W2 = OUT_DIM * HID_DIM                                    # 256
N_B2 = OUT_DIM                                              # 8
NUM_TARGET_PARAMS = N_W1 + N_B1 + N_W2 + N_B2               # 808
NUM_EMBEDDINGS = 3                                          # E
EMBEDDING_DIM = 32                                          # D
WEIGHT_CHUNK_DIM = -(-NUM_TARGET_PARAMS // NUM_EMBEDDINGS)  # C = ceil(808/3) = 270
GEN_TOTAL = NUM_EMBEDDINGS * WEIGHT_CHUNK_DIM               # 810 (flat generated_params)
GEN_ROWS, GEN_LANES = 8, 128                                # generator output tile T

_VMEM = pl.BlockSpec(memory_space=pltpu.MemorySpace.VMEM)


# ---------------- fused Pallas kernel (whole forward) ----------------
def fused_forward_kernel(x_ref, l_ref, r_ref, y_ref, t_ref):
    """TorchHyperNetwork.forward in one grid-less kernel.

    Layout of the generator output tile T (8, 128) (fixed at setup time):
      rows 0..3 , lanes 32g..32g+31 : (W1.T)[4g:4g+4, :]   (g = 0..3)
      rows 4..7 , lanes  8a..8a+7   : (W2.T)[4a:4a+4, :]   (a = 0..7)
      row 4     , lanes 64..95      : b1
      row 4     , lanes 96..103     : b2
      row 4     , lanes 104..105    : unused tail of generated_params
    Only static slices, plain NN dots and elementwise ops are used.
    """
    def dot(a, b):
        return jnp.dot(a, b, preferred_element_type=jnp.float32)

    # 1) generator: one lane-dense matmul produces every generated parameter
    #    (biases included) directly in the layouts the target MLP consumes.
    t = dot(l_ref[...], r_ref[...])                       # (8, 128)
    t_ref[...] = t

    x = x_ref[...]                                        # (8, 16)

    # 2) layer 1: h = relu(x @ W1.T + b1)
    #    W1.T (16,32) lives in rows 0..3 of t as four (4,32) lane groups.
    h = t[4:5, 64:96]                                     # b1 (1, 32)
    for g in range(4):
        h = h + dot(x[:, 4 * g:4 * g + 4], t[0:4, 32 * g:32 * g + 32])
    h = jnp.maximum(h, 0.0)

    # 3) layer 2: y = h @ W2.T + b2
    #    W2.T (32,8) lives in rows 4..7 of t as eight (4,8) lane groups.
    y = t[4:5, 96:104]                                    # b2 (1, 8)
    for a in range(8):
        y = y + dot(h[:, 4 * a:4 * a + 4], t[4:8, 8 * a:8 * a + 8])
    y_ref[...] = y


@jax.jit
def _fused_forward(x, l_op, r_op, inv_idx):
    y, t = pl.pallas_call(
        fused_forward_kernel,
        out_shape=(
            jax.ShapeDtypeStruct((x.shape[0], OUT_DIM), jnp.float32),
            jax.ShapeDtypeStruct((GEN_ROWS, GEN_LANES), jnp.float32),
        ),
        in_specs=[_VMEM, _VMEM, _VMEM],
        out_specs=(_VMEM, _VMEM),
    )(x, l_op, r_op)
    # module's flat generated_params (.view(-1)) recovered by an index
    # permutation of the kernel's output tile (wrapper-side layout plumbing).
    generated_params = t.reshape(-1)[inv_idx]             # (810,)
    return y, generated_params


# ---------------- one-time parameter setup (all layout plumbing lives here) ----
def prepare_hypernetwork(emb_table, gen_w, gen_b):
    """Input-independent restructuring of the hypernetwork parameters.

    Every generated parameter is  gp[k] = emb[k//C] . gen_w[k%C] + gen_b[k%C].
    We build one left operand L (8, 424) and one right operand R (424, 128)
    such that T = L @ R holds every gp element, placed so W1^T / W2^T / b1 / b2
    are rectangular sub-blocks of T.  Each of T's rows gets its own compact
    embedding-augmentation block ([emb_e | 1] or [emb_e | emb_e' | 1]) in L,
    and the matching permuted copy of [gen_w | gen_b] columns in R.
    """
    emb = np.asarray(emb_table, dtype=np.float32)          # (3, 32)
    gw = np.asarray(gen_w, dtype=np.float32)               # (270, 32)
    gb = np.asarray(gen_b, dtype=np.float32)               # (270,)
    C = WEIGHT_CHUNK_DIM

    # ---- which flat gp index lands at each (row, lane) of T; -1 = zero ----
    k_idx = np.full((GEN_ROWS, GEN_LANES), -1, dtype=np.int64)
    r4 = np.arange(4)[:, None]
    lane = np.arange(GEN_LANES)[None, :]
    g, h = lane // HID_DIM, lane % HID_DIM
    k_idx[0:4, :] = h * IN_DIM + 4 * g + r4                          # W1.T blocks
    lane64 = np.arange(64)[None, :]
    a, o = lane64 // OUT_DIM, lane64 % OUT_DIM
    k_idx[4:8, 0:64] = N_W1 + N_B1 + o * HID_DIM + 4 * a + r4        # W2.T blocks
    k_idx[4, 64:96] = N_W1 + np.arange(HID_DIM)                      # b1
    k_idx[4, 96:104] = N_W1 + N_B1 + N_W2 + np.arange(OUT_DIM)       # b2
    k_idx[4, 104:106] = NUM_TARGET_PARAMS + np.arange(GEN_TOTAL - NUM_TARGET_PARAMS)
    valid = k_idx >= 0
    assert np.array_equal(np.sort(k_idx[valid]), np.arange(GEN_TOTAL))

    # ---- per-row compact embedding-augmentation blocks ----
    # rows 0..3 touch embeddings {0,1}; row 4 touches {1,2}; rows 5..7 touch {2}
    row_es = [(0, 1)] * 4 + [(1, 2)] + [(2,)] * 3
    widths = [EMBEDDING_DIM * len(es) + 1 for es in row_es]
    k_tot = sum(widths)                                    # 424
    L = np.zeros((GEN_ROWS, k_tot), np.float32)
    R = np.zeros((k_tot, GEN_LANES), np.float32)
    off = 0
    for row, (es, w) in enumerate(zip(row_es, widths)):
        L[row, off:off + w] = np.concatenate(
            [emb[e] for e in es] + [np.ones(1, np.float32)])
        for lane_i in range(GEN_LANES):
            k = int(k_idx[row, lane_i])
            if k < 0:
                continue
            e, c = divmod(k, C)
            s = es.index(e)
            R[off + EMBEDDING_DIM * s: off + EMBEDDING_DIM * (s + 1), lane_i] = gw[c]
            R[off + w - 1, lane_i] = gb[c]
        off += w

    # inverse map: flat gp index -> flat position inside T
    inv = np.zeros(GEN_TOTAL, np.int32)
    inv[k_idx[valid]] = np.arange(GEN_ROWS * GEN_LANES).reshape(
        GEN_ROWS, GEN_LANES)[valid]

    return {
        "ops": (jnp.asarray(L), jnp.asarray(R)),
        "inv_idx": jnp.asarray(inv),
        "emb_table": emb_table,
    }


# ---------------- external-generated_params path (compat with module API) ------
def target_mlp_kernel(x_ref, w1t_ref, b1_ref, w2t_ref, b2_ref, o_ref):
    h = jnp.dot(x_ref[...], w1t_ref[...], preferred_element_type=jnp.float32) + b1_ref[...]
    h = jnp.maximum(h, 0.0)
    o_ref[...] = jnp.dot(h, w2t_ref[...], preferred_element_type=jnp.float32) + b2_ref[...]


@jax.jit
def target_forward_from_flat(generated_params, x):
    """FunctionalParamVectorWrapper path for an externally supplied flat vector."""
    i = 0
    w1 = generated_params[i:i + N_W1].reshape(HID_DIM, IN_DIM); i += N_W1
    b1 = generated_params[i:i + N_B1]; i += N_B1
    w2 = generated_params[i:i + N_W2].reshape(OUT_DIM, HID_DIM); i += N_W2
    b2 = generated_params[i:i + N_B2]; i += N_B2
    return pl.pallas_call(
        target_mlp_kernel,
        out_shape=jax.ShapeDtypeStruct((x.shape[0], OUT_DIM), jnp.float32),
        in_specs=[_VMEM] * 5,
        out_specs=_VMEM,
    )(x, w1.T, b1.reshape(1, -1), w2.T, b2.reshape(1, -1))


def hypernetwork_forward(x, params, generated_params=None, has_aux=False):
    """TorchHyperNetwork.forward."""
    aux = {}
    if generated_params is None:
        l_op, r_op = params["ops"]
        out, generated_params = _fused_forward(x, l_op, r_op, params["inv_idx"])
        aux = {"embedding": params["emb_table"]}
    else:
        out = target_forward_from_flat(generated_params, x)
    # assert_parameter_shapes (static shapes -> host/trace-time check)
    assert generated_params.shape[-1] >= NUM_TARGET_PARAMS
    if has_aux:
        return out, generated_params, aux
    return out


# ---------------- pure-JAX reference for validation ----------------
def reference_forward(x, emb_table, gen_w, gen_b):
    hp = jax.lax.Precision.HIGHEST
    gp = (jnp.dot(emb_table, gen_w.T, precision=hp) + gen_b).reshape(-1)
    i = 0
    w1 = gp[i:i + N_W1].reshape(HID_DIM, IN_DIM); i += N_W1
    b1 = gp[i:i + N_B1]; i += N_B1
    w2 = gp[i:i + N_W2].reshape(OUT_DIM, HID_DIM); i += N_W2
    b2 = gp[i:i + N_B2]; i += N_B2
    h = jnp.maximum(jnp.dot(x, w1.T, precision=hp) + b1, 0.0)
    return jnp.dot(h, w2.T, precision=hp) + b2, gp


if __name__ == "__main__":
    key = jax.random.PRNGKey(0)
    k_x, k_emb, k_w, k_b = jax.random.split(key, 4)

    # deterministic synthetic parameters (shapes follow the module's __init__)
    x = jax.random.normal(k_x, (BATCH, IN_DIM), dtype=jnp.float32)
    emb_table = jax.random.normal(k_emb, (NUM_EMBEDDINGS, EMBEDDING_DIM), dtype=jnp.float32)
    bound = 1.0 / np.sqrt(EMBEDDING_DIM)
    gen_w = jax.random.uniform(k_w, (WEIGHT_CHUNK_DIM, EMBEDDING_DIM),
                               minval=-bound, maxval=bound, dtype=jnp.float32)
    gen_b = jax.random.uniform(k_b, (WEIGHT_CHUNK_DIM,),
                               minval=-bound, maxval=bound, dtype=jnp.float32)

    # one-time, input-independent parameter setup (cache & reuse across calls)
    params = prepare_hypernetwork(emb_table, gen_w, gen_b)

    # fused forward (generated_params computed inside the single kernel)
    out, gp, aux = hypernetwork_forward(x, params, has_aux=True)
    out = jax.block_until_ready(out)

    ref_out, ref_gp = reference_forward(x, emb_table, gen_w, gen_b)
    np.testing.assert_allclose(np.asarray(out), np.asarray(ref_out), rtol=2e-5, atol=2e-5)
    np.testing.assert_allclose(np.asarray(gp), np.asarray(ref_gp), rtol=2e-5, atol=2e-5)

    # externally-supplied generated_params path (module API compatibility)
    out2 = hypernetwork_forward(x, params, generated_params=gp)
    np.testing.assert_allclose(np.asarray(out2), np.asarray(ref_out), rtol=2e-5, atol=2e-5)

    assert out.shape == (BATCH, OUT_DIM)
    assert gp.shape == (GEN_TOTAL,)
    assert aux["embedding"].shape == (NUM_EMBEDDINGS, EMBEDDING_DIM)

    print("KERNEL_OK")
</pallas_src>

<mosaic_0001>
module attributes {stable_mosaic.version = 11 : i64} {
  func.func @fused_forward_kernel(%arg0: memref<8x16xf32, #tpu.memory_space<vmem>>, %arg1: memref<8x424xf32, #tpu.memory_space<vmem>>, %arg2: memref<424x128xf32, #tpu.memory_space<vmem>>, %arg3: memref<8x8xf32, #tpu.memory_space<vmem>>, %arg4: memref<8x128xf32, #tpu.memory_space<vmem>>) attributes {dimension_semantics = [], scalar_prefetch = 0 : i64, scratch_operands = 0 : i64, tpu.core_type = #tpu.core_type<tc>} {
    %c0 = arith.constant 0 : index
    %c0_0 = arith.constant 0 : index
    %0 = vector.load %arg1[%c0, %c0_0] : memref<8x424xf32, #tpu.memory_space<vmem>>, vector<8x424xf32>
    %c0_1 = arith.constant 0 : index
    %c0_2 = arith.constant 0 : index
    %1 = vector.load %arg2[%c0_1, %c0_2] : memref<424x128xf32, #tpu.memory_space<vmem>>, vector<424x128xf32>
    %cst = arith.constant dense<0.000000e+00> : vector<8x128xf32>
    %2 = tpu.matmul %0, %1, %cst {dimension_numbers = #tpu.dot_dimension_numbers<[1], [0], [0], [1], [0, 0, 1, 1], [], []>, precision = #tpu.contract_precision<fp32>} : vector<8x424xf32>, vector<424x128xf32>, vector<8x128xf32> -> vector<8x128xf32>
    %c0_3 = arith.constant 0 : index
    %c0_4 = arith.constant 0 : index
    %3 = vector.load %arg4[%c0_3, %c0_4] : memref<8x128xf32, #tpu.memory_space<vmem>>, vector<8x128xf32>
    tpu.vector_store %arg4[%c0_3, %c0_4], %2 {strides = array<i32>} : memref<8x128xf32, #tpu.memory_space<vmem>>, vector<8x128xf32>,
    %c0_5 = arith.constant 0 : index
    %c0_6 = arith.constant 0 : index
    %4 = vector.load %arg0[%c0_5, %c0_6] : memref<8x16xf32, #tpu.memory_space<vmem>>, vector<8x16xf32>
    %5 = vector.extract_strided_slice %2 {offsets = [4, 64], sizes = [1, 32], strides = [1, 1]} : vector<8x128xf32> to vector<1x32xf32>
    %6 = vector.extract_strided_slice %4 {offsets = [0, 0], sizes = [8, 4], strides = [1, 1]} : vector<8x16xf32> to vector<8x4xf32>
    %7 = vector.extract_strided_slice %2 {offsets = [0, 0], sizes = [4, 32], strides = [1, 1]} : vector<8x128xf32> to vector<4x32xf32>
    %cst_7 = arith.constant dense<0.000000e+00> : vector<8x32xf32>
    %8 = tpu.matmul %6, %7, %cst_7 {dimension_numbers = #tpu.dot_dimension_numbers<[1], [0], [0], [1], [0, 0, 1, 1], [], []>, precision = #tpu.contract_precision<fp32>} : vector<8x4xf32>, vector<4x32xf32>, vector<8x32xf32> -> vector<8x32xf32>
    %9 = vector.broadcast %5 : vector<1x32xf32> to vector<8x32xf32>
    %10 = arith.addf %9, %8 : vector<8x32xf32>
    %11 = vector.extract_strided_slice %4 {offsets = [0, 4], sizes = [8, 4], strides = [1, 1]} : vector<8x16xf32> to vector<8x4xf32>
    %12 = vector.extract_strided_slice %2 {offsets = [0, 32], sizes = [4, 32], strides = [1, 1]} : vector<8x128xf32> to vector<4x32xf32>
    %cst_8 = arith.constant dense<0.000000e+00> : vector<8x32xf32>
    %13 = tpu.matmul %11, %12, %cst_8 {dimension_numbers = #tpu.dot_dimension_numbers<[1], [0], [0], [1], [0, 0, 1, 1], [], []>, precision = #tpu.contract_precision<fp32>} : vector<8x4xf32>, vector<4x32xf32>, vector<8x32xf32> -> vector<8x32xf32>
    %14 = arith.addf %10, %13 : vector<8x32xf32>
    %15 = vector.extract_strided_slice %4 {offsets = [0, 8], sizes = [8, 4], strides = [1, 1]} : vector<8x16xf32> to vector<8x4xf32>
    %16 = vector.extract_strided_slice %2 {offsets = [0, 64], sizes = [4, 32], strides = [1, 1]} : vector<8x128xf32> to vector<4x32xf32>
    %cst_9 = arith.constant dense<0.000000e+00> : vector<8x32xf32>
    %17 = tpu.matmul %15, %16, %cst_9 {dimension_numbers = #tpu.dot_dimension_numbers<[1], [0], [0], [1], [0, 0, 1, 1], [], []>, precision = #tpu.contract_precision<fp32>} : vector<8x4xf32>, vector<4x32xf32>, vector<8x32xf32> -> vector<8x32xf32>
    %18 = arith.addf %14, %17 : vector<8x32xf32>
    %19 = vector.extract_strided_slice %4 {offsets = [0, 12], sizes = [8, 4], strides = [1, 1]} : vector<8x16xf32> to vector<8x4xf32>
    %20 = vector.extract_strided_slice %2 {offsets = [0, 96], sizes = [4, 32], strides = [1, 1]} : vector<8x128xf32> to vector<4x32xf32>
    %cst_10 = arith.constant dense<0.000000e+00> : vector<8x32xf32>
    %21 = tpu.matmul %19, %20, %cst_10 {dimension_numbers = #tpu.dot_dimension_numbers<[1], [0], [0], [1], [0, 0, 1, 1], [], []>, precision = #tpu.contract_precision<fp32>} : vector<8x4xf32>, vector<4x32xf32>, vector<8x32xf32> -> vector<8x32xf32>
    %22 = arith.addf %18, %21 : vector<8x32xf32>
    %cst_11 = arith.constant 0.000000e+00 : f32
    %23 = vector.broadcast %cst_11 : f32 to vector<8x32xf32>
    %24 = arith.maximumf %22, %23 : vector<8x32xf32>
    %25 = vector.extract_strided_slice %2 {offsets = [4, 96], sizes = [1, 8], strides = [1, 1]} : vector<8x128xf32> to vector<1x8xf32>
    %26 = vector.extract_strided_slice %24 {offsets = [0, 0], sizes = [8, 4], strides = [1, 1]} : vector<8x32xf32> to vector<8x4xf32>
    %27 = vector.extract_strided_slice %2 {offsets = [4, 0], sizes = [4, 8], strides = [1, 1]} : vector<8x128xf32> to vector<4x8xf32>
    %cst_12 = arith.constant dense<0.000000e+00> : vector<8x8xf32>
    %28 = tpu.matmul %26, %27, %cst_12 {dimension_numbers = #tpu.dot_dimension_numbers<[1], [0], [0], [1], [0, 0, 1, 1], [], []>, precision = #tpu.contract_precision<fp32>} : vector<8x4xf32>, vector<4x8xf32>, vector<8x8xf32> -> vector<8x8xf32>
    %29 = vector.broadcast %25 : vector<1x8xf32> to vector<8x8xf32>
    %30 = arith.addf %29, %28 : vector<8x8xf32>
    %31 = vector.extract_strided_slice %24 {offsets = [0, 4], sizes = [8, 4], strides = [1, 1]} : vector<8x32xf32> to vector<8x4xf32>
    %32 = vector.extract_strided_slice %2 {offsets = [4, 8], sizes = [4, 8], strides = [1, 1]} : vector<8x128xf32> to vector<4x8xf32>
    %cst_13 = arith.constant dense<0.000000e+00> : vector<8x8xf32>
    %33 = tpu.matmul %31, %32, %cst_13 {dimension_numbers = #tpu.dot_dimension_numbers<[1], [0], [0], [1], [0, 0, 1, 1], [], []>, precision = #tpu.contract_precision<fp32>} : vector<8x4xf32>, vector<4x8xf32>, vector<8x8xf32> -> vector<8x8xf32>
    %34 = arith.addf %30, %33 : vector<8x8xf32>
    %35 = vector.extract_strided_slice %24 {offsets = [0, 8], sizes = [8, 4], strides = [1, 1]} : vector<8x32xf32> to vector<8x4xf32>
    %36 = vector.extract_strided_slice %2 {offsets = [4, 16], sizes = [4, 8], strides = [1, 1]} : vector<8x128xf32> to vector<4x8xf32>
    %cst_14 = arith.constant dense<0.000000e+00> : vector<8x8xf32>
    %37 = tpu.matmul %35, %36, %cst_14 {dimension_numbers = #tpu.dot_dimension_numbers<[1], [0], [0], [1], [0, 0, 1, 1], [], []>, precision = #tpu.contract_precision<fp32>} : vector<8x4xf32>, vector<4x8xf32>, vector<8x8xf32> -> vector<8x8xf32>
    %38 = arith.addf %34, %37 : vector<8x8xf32>
    %39 = vector.extract_strided_slice %24 {offsets = [0, 12], sizes = [8, 4], strides = [1, 1]} : vector<8x32xf32> to vector<8x4xf32>
    %40 = vector.extract_strided_slice %2 {offsets = [4, 24], sizes = [4, 8], strides = [1, 1]} : vector<8x128xf32> to vector<4x8xf32>
    %cst_15 = arith.constant dense<0.000000e+00> : vector<8x8xf32>
    %41 = tpu.matmul %39, %40, %cst_15 {dimension_numbers = #tpu.dot_dimension_numbers<[1], [0], [0], [1], [0, 0, 1, 1], [], []>, precision = #tpu.contract_precision<fp32>} : vector<8x4xf32>, vector<4x8xf32>, vector<8x8xf32> -> vector<8x8xf32>
    %42 = arith.addf %38, %41 : vector<8x8xf32>
    %43 = vector.extract_strided_slice %24 {offsets = [0, 16], sizes = [8, 4], strides = [1, 1]} : vector<8x32xf32> to vector<8x4xf32>
    %44 = vector.extract_strided_slice %2 {offsets = [4, 32], sizes = [4, 8], strides = [1, 1]} : vector<8x128xf32> to vector<4x8xf32>
    %cst_16 = arith.constant dense<0.000000e+00> : vector<8x8xf32>
    %45 = tpu.matmul %43, %44, %cst_16 {dimension_numbers = #tpu.dot_dimension_numbers<[1], [0], [0], [1], [0, 0, 1, 1], [], []>, precision = #tpu.contract_precision<fp32>} : vector<8x4xf32>, vector<4x8xf32>, vector<8x8xf32> -> vector<8x8xf32>
    %46 = arith.addf %42, %45 : vector<8x8xf32>
    %47 = vector.extract_strided_slice %24 {offsets = [0, 20], sizes = [8, 4], strides = [1, 1]} : vector<8x32xf32> to vector<8x4xf32>
    %48 = vector.extract_strided_slice %2 {offsets = [4, 40], sizes = [4, 8], strides = [1, 1]} : vector<8x128xf32> to vector<4x8xf32>
    %cst_17 = arith.constant dense<0.000000e+00> : vector<8x8xf32>
    %49 = tpu.matmul %47, %48, %cst_17 {dimension_numbers = #tpu.dot_dimension_numbers<[1], [0], [0], [1], [0, 0, 1, 1], [], []>, precision = #tpu.contract_precision<fp32>} : vector<8x4xf32>, vector<4x8xf32>, vector<8x8xf32> -> vector<8x8xf32>
    %50 = arith.addf %46, %49 : vector<8x8xf32>
    %51 = vector.extract_strided_slice %24 {offsets = [0, 24], sizes = [8, 4], strides = [1, 1]} : vector<8x32xf32> to vector<8x4xf32>
    %52 = vector.extract_strided_slice %2 {offsets = [4, 48], sizes = [4, 8], strides = [1, 1]} : vector<8x128xf32> to vector<4x8xf32>
    %cst_18 = arith.constant dense<0.000000e+00> : vector<8x8xf32>
    %53 = tpu.matmul %51, %52, %cst_18 {dimension_numbers = #tpu.dot_dimension_numbers<[1], [0], [0], [1], [0, 0, 1, 1], [], []>, precision = #tpu.contract_precision<fp32>} : vector<8x4xf32>, vector<4x8xf32>, vector<8x8xf32> -> vector<8x8xf32>
    %54 = arith.addf %50, %53 : vector<8x8xf32>
    %55 = vector.extract_strided_slice %24 {offsets = [0, 28], sizes = [8, 4], strides = [1, 1]} : vector<8x32xf32> to vector<8x4xf32>
    %56 = vector.extract_strided_slice %2 {offsets = [4, 56], sizes = [4, 8], strides = [1, 1]} : vector<8x128xf32> to vector<4x8xf32>
    %cst_19 = arith.constant dense<0.000000e+00> : vector<8x8xf32>
    %57 = tpu.matmul %55, %56, %cst_19 {dimension_numbers = #tpu.dot_dimension_numbers<[1], [0], [0], [1], [0, 0, 1, 1], [], []>, precision = #tpu.contract_precision<fp32>} : vector<8x4xf32>, vector<4x8xf32>, vector<8x8xf32> -> vector<8x8xf32>
    %58 = arith.addf %54, %57 : vector<8x8xf32>
    %c0_20 = arith.constant 0 : index
    %c0_21 = arith.constant 0 : index
    %59 = vector.load %arg3[%c0_20, %c0_21] : memref<8x8xf32, #tpu.memory_space<vmem>>, vector<8x8xf32>
    tpu.vector_store %arg3[%c0_20, %c0_21], %58 {strides = array<i32>} : memref<8x8xf32, #tpu.memory_space<vmem>>, vector<8x8xf32>,
    return
  }
}

</mosaic_0001>

<bundles_post_ra>
// kernel: _fused_forward.1
= control target key start
LH: loop header
LB: loop body
LE: loop exit
PB: predicated region body
PF: predicated region fallthrough
CT: control target
= control target key end

     0   :  { %10 = vsyncpa [#allocation3], 0  ;;  %s9647_s0 = inlined_call_operand.hbm [shape: f32[8,16], index: 0, kind: input, shape index: {}]   ;;  %s9648_s1 = inlined_call_operand.vmem [shape: f32[8,424], index: 1, kind: input, shape index: {}]   ;;  %s9649_s2 = inlined_call_operand.hbm [shape: f32[424,128], index: 2, kind: input, shape index: {}]   ;;  %s9650_s3 = inlined_call_operand.hbm [shape: f32[8,8], index: 3, kind: output, shape index: {0}]   ;;  %s9651_s4 = inlined_call_operand.vmem [shape: f32[8,128], index: 4, kind: output, shape index: {1}]  }
   0x1   :  { %11 = vsyncpa [#allocation6], 0 }
   0x2   :  { %12 = vsyncpa [#allocation4], 0  ;;  %s8031_s15 = smov [#allocation2]   ;;  %s8032_s17 = smov [#allocation5]  }
   0x3   :  { %s19_s16 = sshll.u32 %s8031_s15, 4  ;;  %s30_s18 = sshll.u32 %s8032_s17, 4  ;;  %s20_s16 = int_to_ptr.vmem [resolvable:$true] %s19_s16  ;;  %s31_s18 = int_to_ptr.vmem [resolvable:$true] %s30_s18 }
   0x4   :  { %s7973_s19 = scalar_lea.vmem %s20_s16, 128  ;;  %p7978_p1 = scmp.lt.s32.totalorder %s20_s16, %s20_s16 }
   0x5   :  { %p7974_p0 = scmp.ne.s32.totalorder %s20_s16, %s7973_s19  ;;  %p7979_p2 = scmp.lt.s32.totalorder %s7973_s19, %s7973_s19 }
   0x7   :  { %p7980_p3 = por %p7979_p2, %p7978_p1 }
   0x9   :  { %p7981_p4 = pnand %p7980_p3, %p7974_p0 }
   0xb   :  { %7984 = shalt.err (!%p7981_p4)
}
   0xc   :  { %22 = dma.hbm_to_vmem [thread:$0]  %s9647_s0, 128, %s20_s16, [#allocation3]  }
   0xd   :  { %s7993_s22 = scalar_lea.vmem %s31_s18, 6784  ;;  %p7998_p6 = scmp.lt.s32.totalorder %s31_s18, %s31_s18 }
   0xe   :  { %p7994_p5 = scmp.ne.s32.totalorder %s31_s18, %s7993_s22  ;;  %p7999_p7 = scmp.lt.s32.totalorder %s7993_s22, %s7993_s22 }
  0x10   :  { %p8000_p8 = por %p7999_p7, %p7998_p6 }
  0x12   :  { %p8001_p9 = pnand %p8000_p8, %p7994_p5 }
  0x14   :  { %8004 = shalt.err (!%p8001_p9)
}
  0x15   :  { %s8033_s23 = smov 128   ;;  %s8034_s24 = smov 8  }
  0x16   :  { %36 = dma.hbm_to_vmem [thread:$0]  %s9649_s2, 6784, %s31_s18, [#allocation6], %s8033_s23, %s8033_s23, %s8034_s24  }
  0x17   :  { %8025 = dma.done.wait [#allocation3], 128  }
  0x18   :  { %8026 = vsyncadd [#allocation3], 4294967168 }
  0x19   :  { %8027 = dma.done.wait [#allocation6], 6784  }
  0x1a   :  { %8028 = vsyncadd [#allocation6], 4294960512  ;;  %v78_v0 = vld [vmem:[#allocation5 + $0xf8] sm:$0xff]  ;;  %v77_v2 = vld [vmem:[#allocation5 + $0xf0] sm:$0xff]  ;;  %vm100_vm0 = vcmask 326656   ;;  %s8037_s7 = smov 120  }
  0x1b   :  { %v62_v1 = vld [vmem:[#allocation5 + $0x78] sm:$0xff]  ;;  %v8087_v3 = vand.u32 4294901760, %v78_v0  ;;  %v8091_v5 = vand.u32 4294901760, %v77_v2  ;;  %v61_v6 = vld [vmem:[#allocation5 + $0x70] sm:$0xff]  ;;  %v76_v7 = vld [vmem:[#allocation5 + $0xe8] sm:$0xff]  ;;  %vm8038_vm1 = vmmov 0  }
  0x1c   :  { %v8089_v4 = vand.u32 4294901760, %v62_v1  ;;  %v60_v8 = vld [vmem:[#allocation5 + $0x68] sm:$0xff]  ;;  %v8093_v9 = vand.u32 4294901760, %v61_v6  ;;  %v8095_v10 = vand.u32 4294901760, %v76_v7  ;;  %v75_v12 = vld [vmem:[#allocation5 + $0xe0] sm:$0xff]  ;;  %v74_v14 = vld [vmem:[#allocation5 + $0xd8] sm:$0xff] }
  0x1d   :  { %v8097_v11 = vand.u32 4294901760, %v60_v8  ;;  %v59_v13 = vld [vmem:[#allocation5 + $0x60] sm:$0xff]  ;;  %7226 = vmatprep.subr.mxu0 %v8087_v3  ;;  %v8100_v15 = vand.u32 4294901760, %v75_v12  ;;  %v8104_v17 = vand.u32 4294901760, %v74_v14  ;;  %v8107_v18 = vsub.f32 %v78_v0, %v8087_v3  ;;  %v8109_v19 = vld [vmem:[#allocation5 + $0x58] sm:$0xff]  ;;  %v8111_v20 = vld [vmem:[#allocation5 + $0xd0] sm:$0xff] }
  0x1e   :  { %v8102_v16 = vand.u32 4294901760, %v59_v13  ;;  %v8113_v21 = vld [vmem:[#allocation5 + $0x50] sm:$0xff]  ;;  %7227 = vmatpush3.msra.mxu0 %v8089_v4  ;;  %v8117_v22 = vand.u32 4294901760, %v8109_v19  ;;  %v8120_v23 = vsub.f32 %v62_v1, %v8089_v4  ;;  %v8123_v24 = vand.u32 4294901760, %v8111_v20  ;;  %v8128_v26 = vld [vmem:[#allocation5 + $0xc8] sm:$0xff]  ;;  %v8132_v28 = vld [vmem:[#allocation5 + $0xc0] sm:$0xff] }
  0x1f   :  { %v8126_v25 = vsub.f32 %v77_v2, %v8091_v5  ;;  %v8130_v27 = vld [vmem:[#allocation5 + $0x48] sm:$0xff]  ;;  %7228 = vmatprep.subr.mxu0 %v8091_v5  ;;  %v9665_v29 = vand.u32 4294901760, %v8107_v18  ;;  %v8137_v30 = vand.u32 4294901760, %v8113_v21  ;;  %v8140_v31 = vsub.f32 %v61_v6, %v8093_v9  ;;  %v8154_v37 = vld [vmem:[#allocation5 + $0x40] sm:$0xff]  ;;  %v8178_v46 = vld [vmem:[#allocation5 + $0xb8] sm:$0xff]  ;;  %s8039_s10 = smov 64  }
  0x20   :  { %v8143_v32 = vand.u32 4294901760, %v8128_v26  ;;  %7229 = vmatpush3.msra.mxu0 %v8093_v9  ;;  %v9663_v33 = vand.u32 4294901760, %v8120_v23  ;;  %v8149_v35 = vsub.f32 %v76_v7, %v8095_v10  ;;  %v8152_v36 = vand.u32 4294901760, %v8130_v27  ;;  %v8188_v51 = vld [vmem:[#allocation5 + $0x38] sm:$0xff]  ;;  %v8195_v56 = vld [vmem:[#allocation5 + $0xb0] sm:$0xff]  ;;  %v8219_v2 = vld [vmem:[#allocation5 + $0xa8] sm:$0xff] }
  0x21   :  { %9736 = vst [vmem:[#allocation11_spill] sm:$0xff] %v8137_v30  ;;  %v9662_v34 = vand.u32 4294901760, %v8126_v25  ;;  %7230 = vmatprep.subr.mxu0 %v8095_v10  ;;  %v332_v38 = vsub.f32 %v8107_v18, %v9665_v29  ;;  %v9660_v39 = vand.u32 4294901760, %v8140_v31  ;;  %v8162_v40 = vsub.f32 %v60_v8, %v8097_v11  ;;  %v8207_v61 = vld [vmem:[#allocation5 + $0x30] sm:$0xff]  ;;  %s8040_s11 = smov 96   ;;  %s8041_s12 = smov 32  }
  0x22   :  { %9737 = vst [vmem:[#allocation12_spill] sm:$0xff] %v8143_v32  ;;  %9738 = vst [vmem:[#allocation13_spill] sm:$0xff] %v8152_v36  ;;  %v8165_v41 = vand.u32 4294901760, %v8132_v28  ;;  %7231 = vmatpush3.msra.mxu0 %v8097_v11  ;;  %v220_v42 = vsub.f32 %v8120_v23, %v9663_v33  ;;  %v9658_v44 = vand.u32 4294901760, %v8149_v35  ;;  %v8176_v45 = vsub.f32 %v75_v12, %v8100_v15  ;;  %s8043_s13 = smov 60   ;;  %s8044_s14 = smov 56  }
  0x23   :  { %v339_v43 = vsub.f32 %v8126_v25, %v9662_v34  ;;  %7232 = vmatprep.subr.mxu0 %v8100_v15  ;;  %v333_v47 = vand.u32 4294901760, %v332_v38  ;;  %v227_v48 = vsub.f32 %v8140_v31, %v9660_v39  ;;  %v9657_v49 = vand.u32 4294901760, %v8162_v40  ;;  %v8310_v39 = vld [vmem:[#allocation5 + $0x90] sm:$0xff]  ;;  %s8045_s15 = smov 52   ;;  %s8046_s16 = smov 112  }
  0x24   :  { %9739 = vst [vmem:[#allocation14_spill] sm:$0xff] %v8165_v41  ;;  %v8186_v50 = vand.u32 4294901760, %v8154_v37  ;;  %7233 = vmatpush3.msra.mxu0 %v8102_v16  ;;  %v221_v52 = vand.u32 4294901760, %v220_v42  ;;  %v346_v54 = vsub.f32 %v8149_v35, %v9658_v44  ;;  %v9655_v55 = vand.u32 4294901760, %v8176_v45  ;;  %v8320_v34 = vld [vmem:[#allocation5 + $0x10] sm:$0xff]  ;;  %s8047_s17 = smov 48  }
  0x25   :  { %v340_v53 = vand.u32 4294901760, %v339_v43  ;;  %7234 = vmatprep.subr.mxu0 %v8104_v17  ;;  %7261 = vmatprep.subr.mxu1 %v333_v47  ;;  %v228_v57 = vand.u32 4294901760, %v227_v48  ;;  %v234_v58 = vsub.f32 %v8162_v40, %v9657_v49  ;;  %v8202_v59 = vsub.f32 %v59_v13, %v8102_v16  ;;  %v8230_v13 = vld [vmem:[#allocation5 + $0x28] sm:$0xff]  ;;  %v8297_v49 = vld [vmem:[#allocation5 + $0x18] sm:$0xff]  ;;  %s8048_s18 = smov 104   ;;  %s8049_s19 = smov 44  }
  0x26   :  { %9740 = vst [vmem:[#allocation15_spill] sm:$0xff] %v8186_v50  ;;  %v8205_v60 = vand.u32 4294901760, %v8178_v46  ;;  %7235 = vmatpush3.msra.mxu0 %v8117_v22  ;;  %7262 = vmatpush3.msra.mxu1 %v221_v52  ;;  %v347_v62 = vand.u32 4294901760, %v346_v54  ;;  %v353_v63 = vsub.f32 %v8176_v45, %v9655_v55  ;;  %v8214_v0 = vsub.f32 %v74_v14, %v8104_v17  ;;  %s8050_s20 = smov 40   ;;  %s8051_s21 = smov 88  }
  0x27   :  { %v8217_v1 = vand.u32 4294901760, %v8188_v51  ;;  %7236 = vmatprep.subr.mxu0 %v8123_v24  ;;  %7263 = vmatprep.subr.mxu1 %v340_v53  ;;  %v235_v6 = vand.u32 4294901760, %v234_v58  ;;  %v9653_v7 = vand.u32 4294901760, %v8202_v59  ;;  %v8225_v8 = vsub.f32 %v8109_v19, %v8117_v22  ;;  %s8052_s22 = smov 36   ;;  %s8053_s23 = smov 80  }
  0x28   :  { %9741 = vst [vmem:[#allocation16_spill] sm:$0xff] %v8205_v60  ;;  %v8228_v12 = vand.u32 4294901760, %v8195_v56  ;;  %7237 = vmatpush3.msra.mxu0 %v8137_v30  ;;  %7264 = vmatpush3.msra.mxu1 %v228_v57  ;;  %v354_v14 = vand.u32 4294901760, %v353_v63  ;;  %v9652_v38 = vand.u32 4294901760, %v8214_v0  ;;  %v8236_v42 = vsub.f32 %v8111_v20, %v8123_v24  ;;  %v8253_v20 = vld [vmem:[#allocation5 + $0xa0] sm:$0xff]  ;;  %s8054_s24 = smov 72  }
  0x29   :  { %9742 = vst [vmem:[#allocation17_spill] sm:$0xff] %v8217_v1  ;;  %v8239_v43 = vand.u32 4294901760, %v8207_v61  ;;  %7238 = vmatprep.subr.mxu0 %v8143_v32  ;;  %7265 = vmatprep.subr.mxu1 %v347_v62  ;;  %v241_v19 = vsub.f32 %v8202_v59, %v9653_v7  ;;  %v9654_v47 = vand.u32 4294901760, %v8225_v8  ;;  %v8248_v48 = vsub.f32 %v8113_v21, %v8137_v30  ;;  %s8055_s25 = smov [#allocation7]  }
  0x2a   :  { %9743 = vst [vmem:[#allocation18_spill] sm:$0xff] %v8228_v12  ;;  %v8251_v52 = vand.u32 4294901760, %v8219_v2  ;;  %7239 = vmatpush3.msra.mxu0 %v8152_v36  ;;  %7266 = vmatpush3.msra.mxu1 %v235_v6  ;;  %v360_v53 = vsub.f32 %v8214_v0, %v9652_v38  ;;  %v9656_v54 = vand.u32 4294901760, %v8236_v42  ;;  %v8262_v57 = vsub.f32 %v8128_v26, %v8143_v32  ;;  %v8276_v38 = vld [vmem:[#allocation5 + $0x20] sm:$0xff]  ;;  %s7212_s26 = sshll.u32 %s8055_s25, 4  ;;  %s7213_s26 = int_to_ptr.vmem [resolvable:$true] %s7212_s26 }
  0x2b   :  { %9744 = vst [vmem:[#allocation19_spill] sm:$0xff] %v8239_v43  ;;  %v8265_v21 = vand.u32 4294901760, %v8230_v13  ;;  %7240 = vmatprep.subr.mxu0 %v8165_v41  ;;  %7267 = vmatprep.subr.mxu1 %v354_v14  ;;  %v242_v58 = vand.u32 4294901760, %v241_v19  ;;  %v248_v62 = vsub.f32 %v8225_v8, %v9654_v47  ;;  %v9659_v63 = vand.u32 4294901760, %v8248_v48  ;;  %v8286_v47 = vld [vmem:[#allocation5 + $0x98] sm:$0xff]  ;;  %s8005_s0 = scalar_lea.vmem %s7213_s26, 128  ;;  %p8010_p11 = scmp.lt.s32.totalorder %s7213_s26, %s7213_s26 }
  0x2c   :  { %9745 = vst [vmem:[#allocation20_spill] sm:$0xff] %v8251_v52  ;;  %v8274_v6 = vsub.f32 %v8130_v27, %v8152_v36  ;;  %7241 = vmatpush3.msra.mxu0 %v8186_v50  ;;  %v361_v26 = vand.u32 4294901760, %v360_v53  ;;  %v367_v14 = vsub.f32 %v8236_v42, %v9656_v54  ;;  %v9661_v19 = vand.u32 4294901760, %v8262_v57  ;;  %p8006_p10 = scmp.ne.s32.totalorder %s7213_s26, %s8005_s0  ;;  %p8011_p12 = scmp.lt.s32.totalorder %s8005_s0, %s8005_s0 }
  0x2d   :  { %9746 = vst [vmem:[#allocation21_spill] sm:$0xff] %v8265_v21  ;;  %v8284_v7 = vand.u32 4294901760, %v8253_v20  ;;  %7268 = vmatpush3.msra.mxu1 %v242_v58  ;;  %7242 = vmatprep.subr.mxu0 %v8205_v60  ;;  %v249_v27 = vand.u32 4294901760, %v248_v62  ;;  %v255_v55 = vsub.f32 %v8248_v48, %v9659_v63  ;;  %v8295_v54 = vsub.f32 %v8132_v28, %v8165_v41 }
  0x2e   :  { %v9664_v53 = vand.u32 4294901760, %v8274_v6  ;;  %7269 = vmatprep.subr.mxu1 %v361_v26  ;;  %7243 = vmatpush3.msra.mxu0 %v8217_v1  ;;  %v368_v44 = vand.u32 4294901760, %v367_v14  ;;  %v374_v58 = vsub.f32 %v8262_v57, %v9661_v19  ;;  %v8304_v62 = vand.u32 4294901760, %v8276_v38  ;;  %p8012_p13 = por %p8011_p12, %p8010_p11 }
  0x2f   :  { %9747 = vst [vmem:[#allocation22_spill] sm:$0xff] %v8284_v7  ;;  %v8308_v63 = vsub.f32 %v8154_v37, %v8186_v50  ;;  %7270 = vmatpush3.msra.mxu1 %v249_v27  ;;  %7244 = vmatprep.subr.mxu0 %v8228_v12  ;;  %v256_v28 = vand.u32 4294901760, %v255_v55  ;;  %v9668_v14 = vand.u32 4294901760, %v8295_v54  ;;  %v8318_v19 = vand.u32 4294901760, %v8286_v47 }
  0x30   :  { %9748 = vst [vmem:[#allocation23_spill] sm:$0xff] %v8304_v62  ;;  %v262_v26 = vsub.f32 %v8274_v6, %v9664_v53  ;;  %7271 = vmatprep.subr.mxu1 %v368_v44  ;;  %7245 = vmatpush3.msra.mxu0 %v8239_v43  ;;  %v375_v37 = vand.u32 4294901760, %v374_v58  ;;  %v8326_v55 = vsub.f32 %v8178_v46, %v8205_v60  ;;  %v8329_v33 = vand.u32 4294901760, %v8297_v49  ;;  %v8331_v53 = vld [vmem:[#allocation5 + $0x88] sm:$0xff]  ;;  %p8013_p0 = pnand %p8012_p13, %p8006_p10 }
  0x31   :  { %v9671_v27 = vand.u32 4294901760, %v8308_v63  ;;  %7272 = vmatpush3.msra.mxu1 %v256_v28  ;;  %7246 = vmatprep.subr.mxu0 %v8251_v52  ;;  %v381_v44 = vsub.f32 %v8295_v54, %v9668_v14  ;;  %v8339_v58 = vsub.f32 %v8188_v51, %v8217_v1  ;;  %v8342_v46 = vand.u32 4294901760, %v8310_v39  ;;  %v8356_v51 = vld [vmem:[#allocation5 + $0x8] sm:$0xff] }
  0x32   :  { %9749 = vst [vmem:[#allocation24_spill] sm:$0xff] %v8329_v33  ;;  %v263_v29 = vand.u32 4294901760, %v262_v26  ;;  %7273 = vmatprep.subr.mxu1 %v375_v37  ;;  %7247 = vmatpush3.msra.mxu0 %v8265_v21  ;;  %v8351_v60 = vsub.f32 %v8195_v56, %v8228_v12  ;;  %v8354_v14 = vand.u32 4294901760, %v8320_v34  ;;  %v8365_v26 = vand.u32 4294901760, %v8331_v53  ;;  %v8367_v56 = vld [vmem:[#allocation5 + $0x80] sm:$0xff] }
  0x33   :  { %9750 = vst [vmem:[#allocation25_spill] sm:$0xff] %v8342_v46  ;;  %v269_v28 = vsub.f32 %v8308_v63, %v9671_v27  ;;  %7248 = vmatprep.subr.mxu0 %v8284_v7  ;;  %v382_v37 = vand.u32 4294901760, %v381_v44  ;;  %v8362_v27 = vsub.f32 %v8207_v61, %v8239_v43  ;;  %v9754_v50 = vand.u32 4294901760, %v8326_v55  ;;  %v8390_v44 = vld [vmem:[#allocation5] sm:$0xff] }
  0x34   :  { %9751 = vst [vmem:[#allocation26_spill] sm:$0xff] %v8354_v14  ;;  %7274 = vmatpush3.msra.mxu1 %v263_v29  ;;  %9753 = vst [vmem:[#allocation28_spill] sm:$0xff] %v8365_v26  ;;  %7249 = vmatpush3.msra.mxu0 %v8304_v62  ;;  %v8376_v1 = vsub.f32 %v8219_v2, %v8251_v52  ;;  %v9756_v61 = vand.u32 4294901760, %v8339_v58  ;;  %v8398_v41 = vand.u32 4294901760, %v8367_v56  ;;  %vm1687_vm2 = vcmask 31744  }
  0x35   :  { %9752 = vst [vmem:[#allocation27_spill] sm:$0xff] %v8362_v27  ;;  %v270_v12 = vand.u32 4294901760, %v269_v28  ;;  %v388_v29 = vsub.f32 %v8326_v55, %v9754_v50  ;;  %7275 = vmatprep.subr.mxu1 %v382_v37  ;;  %7250 = vmatprep.subr.mxu0 %v8318_v19  ;;  %v8384_v28 = vand.u32 4294901760, %v8356_v51  ;;  %v8388_v50 = vsub.f32 %v8230_v13, %v8265_v21  ;;  %v44_v13 = vld [vmem:[%s9648_s1 + $0x8] sm:$0xff] }
  0x36   :  { %9755 = vst [vmem:[#allocation29_spill] sm:$0xff] %v8376_v1  ;;  %v276_v43 = vsub.f32 %v8339_v58, %v9756_v61  ;;  %7251 = vmatpush3.msra.mxu0 %v8329_v33  ;;  %v9757_v37 = vand.u32 4294901760, %v8351_v60  ;;  %v43_v61 = vld [vmem:[%s9648_s1] sm:$0xff]  ;;  %v8424_v36 = vsub.f32 %v8276_v38, %v8304_v62  ;;  %v8437_v38 = vsub.f32 %v8286_v47, %v8318_v19 }
  0x37   :  { %7276 = vmatpush3.msra.mxu1 %v270_v12  ;;  %v389_v2 = vand.u32 4294901760, %v388_v29  ;;  %7252 = vmatprep.subr.mxu0 %v8342_v46  ;;  %v9758_v12 = vand.u32 4294901760, %v8362_v27  ;;  %vm1691_vm3 = vcmask 1043456   ;;  %vm7204_vm4 = vcmask 64512  }
  0x38   :  { %v395_v52 = vsub.f32 %v8351_v60, %v9757_v37  ;;  %v277_v21 = vand.u32 4294901760, %v276_v43  ;;  %v8410_v37 = vsub.f32 %v8253_v20, %v8284_v7  ;;  %7253 = vmatpush3.msra.mxu0 %v8354_v14  ;;  %v9759_v43 = vand.u32 4294901760, %v8376_v1 }
  0x39   :  { %v283_v29 = vsub.f32 %v8362_v27, %v9758_v12  ;;  %7277 = vmatprep.subr.mxu1 %v389_v2  ;;  %v8420_v12 = vand.u32 4294901760, %v8390_v44  ;;  %7254 = vmatprep.subr.mxu0 %v8365_v26  ;;  %v9760_v2 = vand.u32 4294901760, %v8388_v50  ;;  %v8431_v27 = vand.u32 4294901760, %v44_v13 }
  0x3a   :  { %v396_v32 = vand.u32 4294901760, %v395_v52  ;;  %v402_v30 = vsub.f32 %v8376_v1, %v9759_v43  ;;  %7278 = vmatpush3.msra.mxu1 %v277_v21  ;;  %v9696_v7 = vand.u32 4294901760, %v8410_v37  ;;  %7255 = vmatpush3.msra.mxu0 %v8384_v28  ;;  %v9697_v1 = vand.u32 4294901760, %v8424_v36 }
  0x3b   :  { %v284_v20 = vand.u32 4294901760, %v283_v29  ;;  %v290_v52 = vsub.f32 %v8388_v50, %v9760_v2  ;;  %9761 = vst [vmem:[#allocation30_spill] sm:$0xff] %v8431_v27  ;;  %v8439_v21 = vand.u32 4294901760, %v43_v61  ;;  %7256 = vmatprep.subr.mxu0 %v8398_v41  ;;  %441 = vmatprep.mubr.f32.mxu1 %v8431_v27 }
  0x3c   :  { %7279 = vmatprep.subr.mxu1 %v396_v32  ;;  %v403_v43 = vand.u32 4294901760, %v402_v30  ;;  %v409_v2 = vsub.f32 %v8410_v37, %v9696_v7  ;;  %v8446_v30 = vsub.f32 %v44_v13, %v8431_v27  ;;  %v8450_v32 = vsub.f32 %v8297_v49, %v8329_v33  ;;  %7257 = vmatpush3.msra.mxu0 %v8420_v12 }
  0x3d   :  { %9762 = vst [vmem:[#allocation31_spill] sm:$0xff] %v8439_v21  ;;  %7280 = vmatpush3.msra.mxu1 %v284_v20  ;;  %v291_v29 = vand.u32 4294901760, %v290_v52  ;;  %v297_v47 = vsub.f32 %v8424_v36, %v9697_v1  ;;  %v8458_v52 = vsub.f32 %v43_v61, %v8439_v21  ;;  %v8462_v13 = vsub.f32 %v8310_v39, %v8342_v46 }
  0x3e   :  { %7281 = vmatprep.subr.mxu1 %v403_v43  ;;  %v410_v7 = vand.u32 4294901760, %v409_v2  ;;  %v9702_v49 = vand.u32 4294901760, %v8446_v30  ;;  %7296 = vmatprep.subr.mxu0 %v8107_v18  ;;  %v9705_v43 = vand.u32 4294901760, %v8450_v32  ;;  %v8469_v1 = vsub.f32 %v8320_v34, %v8354_v14 }
  0x3f   :  { %7282 = vmatpush3.msra.mxu1 %v291_v29  ;;  %v298_v20 = vand.u32 4294901760, %v297_v47  ;;  %v9763_v61 = vand.u32 4294901760, %v8437_v38  ;;  %v9764_v29 = vand.u32 4294901760, %v8458_v52  ;;  %v9765_v27 = vand.u32 4294901760, %v8462_v13 }
  0x40   :  { %7283 = vmatprep.subr.mxu1 %v410_v7  ;;  %v203_v2 = vsub.f32 %v8446_v30, %v9702_v49  ;;  %v304_v34 = vsub.f32 %v8450_v32, %v9705_v43  ;;  %v8496_v14 = vsub.f32 %v8356_v51, %v8384_v28  ;;  %v9767_v46 = vand.u32 4294901760, %v8469_v1 }
  0x41   :  { %v416_v33 = vsub.f32 %v8437_v38, %v9763_v61  ;;  %v8486_v61 = vsub.f32 %v8331_v53, %v8365_v26  ;;  %7284 = vmatpush3.msra.mxu1 %v298_v20  ;;  %v209_v7 = vsub.f32 %v8458_v52, %v9764_v29  ;;  %v423_v49 = vsub.f32 %v8462_v13, %v9765_v27 }
  0x42   :  { %9766 = vst [vmem:[#allocation32_spill] sm:$0xff] %v8496_v14  ;;  %v204_v43 = vand.u32 4294901760, %v203_v2  ;;  %v305_v47 = vand.u32 4294901760, %v304_v34  ;;  %v311_v53 = vsub.f32 %v8469_v1, %v9767_v46  ;;  %v9712_v29 = vand.u32 4294901760, %v8496_v14 }
  0x43   :  { %v417_v39 = vand.u32 4294901760, %v416_v33  ;;  %v9713_v33 = vand.u32 4294901760, %v8486_v61  ;;  %v210_v20 = vand.u32 4294901760, %v209_v7  ;;  %v424_v26 = vand.u32 4294901760, %v423_v49 }
  0x44   :  { %v8505_v27 = vsub.f32 %v8367_v56, %v8398_v41  ;;  %205 = vmatprep.mubr.f32.mxu0 %v204_v43  ;;  %v312_v51 = vand.u32 4294901760, %v311_v53  ;;  %v8512_v46 = vsub.f32 %v8390_v44, %v8420_v12  ;;  %v318_v49 = vsub.f32 %v8496_v14, %v9712_v29  ;;  %v9770_v53 = vld [vmem:[#allocation27_spill] sm:$0xff]  ;;  %v9783_v29 = vld [vmem:[#allocation22_spill] sm:$0xff] }
  0x45   :  { %7285 = vmatprep.subr.mxu1 %v417_v39  ;;  %v430_v2 = vsub.f32 %v8486_v61, %v9713_v33  ;;  %211 = vmatmul.mubr.f32.vlgmr.msra.gmra.mxu0 %v210_v20  ;;  %v9771_v20 = vld [vmem:[#allocation11_spill] sm:$0xff]  ;;  %v9784_v33 = vand.u32 4294901760, %v8107_v18  ;;  %v9792_v18 = vand.u32 4294901760, %v8149_v35 }
  0x46   :  { %9768 = vst [vmem:[#allocation33_spill] sm:$0xff] %v8505_v27  ;;  %7286 = vmatpush3.msra.mxu1 %v305_v47  ;;  %9769 = vst [vmem:[#allocation34_spill] sm:$0xff] %v8512_v46  ;;  %v9711_v56 = vand.u32 4294901760, %v8505_v27  ;;  %7297 = vmatpush3.msra.mxu0 %v8120_v23  ;;  %v9710_v39 = vand.u32 4294901760, %v8512_v46  ;;  %v319_v34 = vand.u32 4294901760, %v318_v49  ;;  %v9774_v49 = vld [vmem:[#allocation13_spill] sm:$0xff] }
  0x47   :  { %7287 = vmatprep.subr.mxu1 %v424_v26  ;;  %v431_v43 = vand.u32 4294901760, %v430_v2  ;;  %7298 = vmatprep.subr.mxu0 %v8126_v25  ;;  %v9773_v2 = vld [vmem:[#allocation12_spill] sm:$0xff] }
  0x48   :  { %7288 = vmatpush3.msra.mxu1 %v312_v51  ;;  %v437_v44 = vsub.f32 %v8505_v27, %v9711_v56  ;;  %578 = vmatprep.mubr.f32.mxu0 %v8446_v30  ;;  %v325_v26 = vsub.f32 %v8512_v46, %v9710_v39  ;;  %v9772_v51 = vld [vmem:[#allocation29_spill] sm:$0xff]  ;;  %v9781_v39 = vld [vmem:[#allocation20_spill] sm:$0xff] }
  0x49   :  { %7299 = vmatpush3.msra.mxu0 %v8140_v31  ;;  %7289 = vmatprep.subr.mxu1 %v431_v43  ;;  %v9775_v43 = vld [vmem:[#allocation14_spill] sm:$0xff]  ;;  %v9782_v56 = vld [vmem:[#allocation21_spill] sm:$0xff] }
  0x4a   :  { %7300 = vmatprep.subr.mxu0 %v8149_v35  ;;  %7290 = vmatpush3.msra.mxu1 %v319_v34  ;;  %v438_v47 = vand.u32 4294901760, %v437_v44  ;;  %v326_v7 = vand.u32 4294901760, %v325_v26  ;;  %v9776_v34 = vld [vmem:[#allocation15_spill] sm:$0xff]  ;;  %v9777_v44 = vld [vmem:[#allocation16_spill] sm:$0xff]  ;;  %v9778_v26 = vld [vmem:[#allocation17_spill] sm:$0xff]  ;;  %v9797_v35 = vand.u32 4294901760, %v8458_v52 }
  0x4b   :  { %7301 = vmatpush3.msra.mxu0 %v8162_v40 }
  0x4c   :  { %7291 = vmatprep.subr.mxu1 %v438_v47  ;;  %7302 = vmatprep.subr.mxu0 %v8176_v45  ;;  %v9779_v47 = vld [vmem:[#allocation18_spill] sm:$0xff] }
  0x4d   :  { %7292 = vmatpush3.msra.mxu1 %v326_v7  ;;  %7303 = vmatpush3.msra.mxu0 %v8202_v59  ;;  %v9780_v7 = vld [vmem:[#allocation19_spill] sm:$0xff] }
  0x4e   :  { %443 = vmatmul.mubr.f32.vlgmr.msra.gmra.mxu1 %v8439_v21  ;;  %7304 = vmatprep.subr.mxu0 %v8214_v0  ;;  %v9785_v21 = vld [vmem:[#allocation24_spill] sm:$0xff] }
  0x4f   :  { %7331 = vmatprep.subr.mxu1 %v8087_v3  ;;  %7305 = vmatpush3.msra.mxu0 %v8225_v8 }
  0x50   :  { %7332 = vmatpush3.msra.mxu1 %v8089_v4  ;;  %7306 = vmatprep.subr.mxu0 %v8236_v42 }
  0x51   :  { %7333 = vmatprep.subr.mxu1 %v8091_v5  ;;  %7307 = vmatpush3.msra.mxu0 %v8248_v48 }
  0x52   :  { %7334 = vmatpush3.msra.mxu1 %v8093_v9  ;;  %7308 = vmatprep.subr.mxu0 %v8262_v57 }
  0x53   :  { %7335 = vmatprep.subr.mxu1 %v8095_v10  ;;  %7309 = vmatpush3.msra.mxu0 %v8274_v6 }
  0x54   :  { %7336 = vmatpush3.msra.mxu1 %v8097_v11  ;;  %7310 = vmatprep.subr.mxu0 %v8295_v54 }
  0x55   :  { %7337 = vmatprep.subr.mxu1 %v8100_v15  ;;  %7311 = vmatpush3.msra.mxu0 %v8308_v63 }
  0x56   :  { %7338 = vmatpush3.msra.mxu1 %v8102_v16  ;;  %7312 = vmatprep.subr.mxu0 %v8326_v55 }
  0x57   :  { %7339 = vmatprep.subr.mxu1 %v8104_v17  ;;  %7313 = vmatpush3.msra.mxu0 %v8339_v58 }
  0x58   :  { %7340 = vmatpush3.msra.mxu1 %v8117_v22  ;;  %7314 = vmatprep.subr.mxu0 %v8351_v60 }
  0x59   :  { %7341 = vmatprep.subr.mxu1 %v8123_v24  ;;  %7315 = vmatpush3.msra.mxu0 %v9770_v53 }
  0x5a   :  { %7342 = vmatpush3.msra.mxu1 %v9771_v20  ;;  %7316 = vmatprep.subr.mxu0 %v9772_v51 }
  0x5b   :  { %7343 = vmatprep.subr.mxu1 %v9773_v2  ;;  %7317 = vmatpush3.msra.mxu0 %v8388_v50 }
  0x5c   :  { %7344 = vmatpush3.msra.mxu1 %v9774_v49  ;;  %7318 = vmatprep.subr.mxu0 %v8410_v37 }
  0x5d   :  { %7345 = vmatprep.subr.mxu1 %v9775_v43  ;;  %7319 = vmatpush3.msra.mxu0 %v8424_v36 }
  0x5e   :  { %7346 = vmatpush3.msra.mxu1 %v9776_v34  ;;  %7320 = vmatprep.subr.mxu0 %v8437_v38 }
  0x5f   :  { %7347 = vmatprep.subr.mxu1 %v9777_v44  ;;  %7321 = vmatpush3.msra.mxu0 %v8450_v32 }
  0x60   :  { %7348 = vmatpush3.msra.mxu1 %v9778_v26  ;;  %7322 = vmatprep.subr.mxu0 %v8462_v13 }
  0x61   :  { %7349 = vmatprep.subr.mxu1 %v9779_v47  ;;  %7323 = vmatpush3.msra.mxu0 %v8469_v1 }
  0x62   :  { %7350 = vmatpush3.msra.mxu1 %v9780_v7  ;;  %7324 = vmatprep.subr.mxu0 %v8486_v61 }
  0x63   :  { %7351 = vmatprep.subr.mxu1 %v9781_v39  ;;  %7325 = vmatpush3.msra.mxu0 %v8496_v14  ;;  %v9786_v14 = vand.u32 4294901760, %v8120_v23  ;;  %v9793_v23 = vand.u32 4294901760, %v8162_v40  ;;  %v9799_v40 = vand.u32 4294901760, %v8225_v8  ;;  %v9811_v8 = vand.u32 4294901760, %v8388_v50 }
  0x64   :  { %7352 = vmatpush3.msra.mxu1 %v9782_v56  ;;  %7326 = vmatprep.subr.mxu0 %v8505_v27  ;;  %v9787_v56 = vld [vmem:[#allocation25_spill] sm:$0xff]  ;;  %v9791_v27 = vld [vmem:[#allocation28_spill] sm:$0xff] }
  0x65   :  { %7353 = vmatprep.subr.mxu1 %v9783_v29  ;;  %7327 = vmatpush3.msra.mxu0 %v8512_v46  ;;  %v9788_v29 = vand.u32 4294901760, %v8126_v25  ;;  %v9789_v46 = vld [vmem:[#allocation26_spill] sm:$0xff]  ;;  %v9794_v25 = vand.u32 4294901760, %v8176_v45  ;;  %v9800_v45 = vand.u32 4294901760, %v8236_v42 }
  0x66   :  { %7354 = vmatpush3.msra.mxu1 %v8304_v62  ;;  %581 = vmatmul.mubr.f32.vlgmr.msra.gmra.mxu0 %v8458_v52  ;;  %v9790_v62 = vand.u32 4294901760, %v8140_v31  ;;  %v9795_v31 = vand.u32 4294901760, %v8446_v30  ;;  %v9819_v30 = vld [vmem:[#allocation32_spill] sm:$0xff]  ;;  %v9821_v52 = vld [vmem:[#allocation21_spill] sm:$0xff] }
  0x67   :  { %7355 = vmatprep.subr.mxu1 %v8318_v19  ;;  %7366 = vmatprep.subr.mxu0 %v9784_v33  ;;  %v89_v33 = vld [vmem:[#allocation5 + $0x150] sm:$0xff] }
  0x68   :  { %7356 = vmatpush3.msra.mxu1 %v9785_v21  ;;  %7367 = vmatpush3.msra.mxu0 %v9786_v14  ;;  %v9798_v14 = vand.u32 4294901760, %v8214_v0  ;;  %v9802_v0 = vand.u32 4294901760, %v8262_v57  ;;  %v9815_v57 = vand.u32 4294901760, %v8450_v32  ;;  %v9820_v32 = vand.u32 4294901760, %v9819_v30 }
  0x69   :  { %7357 = vmatprep.subr.mxu1 %v9787_v56  ;;  %7368 = vmatprep.subr.mxu0 %v9788_v29  ;;  %v9822_v29 = vld [vmem:[#allocation33_spill] sm:$0xff] }
  0x6a   :  { %7358 = vmatpush3.msra.mxu1 %v9789_v46  ;;  %7369 = vmatpush3.msra.mxu0 %v9790_v62  ;;  %v9796_v62 = vand.u32 4294901760, %v8202_v59  ;;  %v9801_v59 = vand.u32 4294901760, %v8248_v48  ;;  %v9814_v48 = vand.u32 4294901760, %v8437_v38  ;;  %v90_v38 = vld [vmem:[#allocation5 + $0x158] sm:$0xff] }
  0x6b   :  { %7359 = vmatprep.subr.mxu1 %v9791_v27  ;;  %7370 = vmatprep.subr.mxu0 %v9792_v18 }
  0x6c   :  { %7360 = vmatpush3.msra.mxu1 %v8384_v28  ;;  %7371 = vmatpush3.msra.mxu0 %v9793_v23 }
  0x6d   :  { %7361 = vmatprep.subr.mxu1 %v8398_v41  ;;  %7372 = vmatprep.subr.mxu0 %v9794_v25  ;;  %v87_v25 = vld [vmem:[#allocation5 + $0x140] sm:$0xff] }
  0x6e   :  { %7362 = vmatpush3.msra.mxu1 %v8420_v12  ;;  %685 = vmatprep.mubr.f32.mxu1 %v9795_v31 }
  0x6f   :  { %7373 = vmatpush3.msra.mxu0 %v9796_v62  ;;  %689 = vmatmul.mubr.f32.vlgmr.msra.gmra.mxu1 %v9797_v35 }
  0x70   :  { %7374 = vmatprep.subr.mxu0 %v9798_v14  ;;  %7401 = vmatprep.subr.mxu1 %v8087_v3  ;;  %v9803_v3 = vand.u32 4294901760, %v8274_v6  ;;  %v91_v6 = vld [vmem:[#allocation5 + $0x160] sm:$0xff]  ;;  %v86_v14 = vld [vmem:[#allocation5 + $0x138] sm:$0xff] }
  0x71   :  { %7375 = vmatpush3.msra.mxu0 %v9799_v40  ;;  %7402 = vmatpush3.msra.mxu1 %v8089_v4  ;;  %v9804_v4 = vand.u32 4294901760, %v8295_v54  ;;  %v92_v54 = vld [vmem:[#allocation5 + $0x168] sm:$0xff] }
  0x72   :  { %7376 = vmatprep.subr.mxu0 %v9800_v45  ;;  %7403 = vmatprep.subr.mxu1 %v8091_v5  ;;  %v9805_v5 = vand.u32 4294901760, %v8308_v63  ;;  %v8678_v50 = vand.u32 4294901760, %v92_v54 }
  0x73   :  { %7377 = vmatpush3.msra.mxu0 %v9801_v59  ;;  %7404 = vmatpush3.msra.mxu1 %v8093_v9  ;;  %v9806_v9 = vand.u32 4294901760, %v8326_v55  ;;  %v9817_v55 = vand.u32 4294901760, %v8469_v1  ;;  %v85_v59 = vld [vmem:[#allocation5 + $0x130] sm:$0xff] }
  0x74   :  { %7378 = vmatprep.subr.mxu0 %v9802_v0  ;;  %7405 = vmatprep.subr.mxu1 %v8095_v10  ;;  %v9807_v10 = vand.u32 4294901760, %v8339_v58 }
  0x75   :  { %7379 = vmatpush3.msra.mxu0 %v9803_v3  ;;  %7406 = vmatpush3.msra.mxu1 %v8097_v11  ;;  %v9808_v11 = vand.u32 4294901760, %v8351_v60  ;;  %v9813_v60 = vand.u32 4294901760, %v8424_v36  ;;  %v9816_v36 = vand.u32 4294901760, %v8462_v13  ;;  %v8689_v13 = vand.u32 4294901760, %v91_v6 }
  0x76   :  { %7380 = vmatprep.subr.mxu0 %v9804_v4  ;;  %7407 = vmatprep.subr.mxu1 %v8100_v15  ;;  %v9809_v15 = vand.u32 4294901760, %v9770_v53  ;;  %v9823_v53 = vand.u32 4294901760, %v9822_v29  ;;  %v80_v29 = vld [vmem:[#allocation5 + $0x108] sm:$0xff] }
  0x77   :  { %7381 = vmatpush3.msra.mxu0 %v9805_v5  ;;  %7408 = vmatpush3.msra.mxu1 %v8102_v16  ;;  %v9810_v16 = vand.u32 4294901760, %v9772_v51  ;;  %v8710_v18 = vsub.f32 %v91_v6, %v8689_v13  ;;  %v84_v5 = vld [vmem:[#allocation5 + $0x128] sm:$0xff] }
  0x78   :  { %7382 = vmatprep.subr.mxu0 %v9806_v9  ;;  %7409 = vmatprep.subr.mxu1 %v8104_v17  ;;  %v94_v17 = vld [vmem:[#allocation5 + $0x178] sm:$0xff] }
  0x79   :  { %7383 = vmatpush3.msra.mxu0 %v9807_v10  ;;  %7410 = vmatpush3.msra.mxu1 %v8117_v22  ;;  %v9812_v22 = vand.u32 4294901760, %v8410_v37  ;;  %v8659_v42 = vand.u32 4294901760, %v94_v17  ;;  %v9818_v37 = vand.u32 4294901760, %v8486_v61  ;;  %v9825_v61 = vld [vmem:[#allocation34_spill] sm:$0xff]  ;;  %v9734_v45 = vand.u32 4294901760, %v8710_v18 }
  0x7a   :  { %7384 = vmatprep.subr.mxu0 %v9808_v11  ;;  %7411 = vmatprep.subr.mxu1 %v8123_v24  ;;  %v93_v24 = vld [vmem:[#allocation5 + $0x170] sm:$0xff]  ;;  %v9826_v51 = vand.u32 4294901760, %v9825_v61  ;;  %v8763_v11 = vand.u32 4294901760, %v85_v59 }
  0x7b   :  { %7385 = vmatpush3.msra.mxu0 %v9809_v15  ;;  %7412 = vmatpush3.msra.mxu1 %v9771_v20  ;;  %v8667_v63 = vand.u32 4294901760, %v93_v24  ;;  %v8676_v58 = vsub.f32 %v94_v17, %v8659_v42  ;;  %v9824_v20 = vld [vmem:[#allocation22_spill] sm:$0xff]  ;;  %v1092_v10 = vsub.f32 %v8710_v18, %v9734_v45  ;;  %v83_v15 = vld [vmem:[#allocation5 + $0x120] sm:$0xff] }
  0x7c   :  { %7386 = vmatprep.subr.mxu0 %v9810_v16  ;;  %7413 = vmatprep.subr.mxu1 %v9773_v2  ;;  %v8698_v2 = vsub.f32 %v92_v54, %v8678_v50 }
  0x7d   :  { %7387 = vmatpush3.msra.mxu0 %v9811_v8  ;;  %7414 = vmatpush3.msra.mxu1 %v9774_v49  ;;  %v8687_v1 = vsub.f32 %v93_v24, %v8667_v63  ;;  %v8700_v49 = vand.u32 4294901760, %v90_v38  ;;  %v8774_v8 = vand.u32 4294901760, %v84_v5  ;;  %v1093_v54 = vand.u32 4294901760, %v1092_v10  ;;  %v45_v10 = vld [vmem:[%s9648_s1 + $0x10] sm:$0xff] }
  0x7e   :  { %7388 = vmatprep.subr.mxu0 %v9812_v22  ;;  %7415 = vmatprep.subr.mxu1 %v9775_v43  ;;  %v1070_v43 = vand.u32 4294901760, %v8676_v58  ;;  %v1084_v35 = vand.u32 4294901760, %v8698_v2 }
  0x7f   :  { %7389 = vmatpush3.msra.mxu0 %v9813_v60  ;;  %7416 = vmatpush3.msra.mxu1 %v9776_v34  ;;  %v9828_v34 = vld [vmem:[#allocation23_spill] sm:$0xff]  ;;  %v1077_v23 = vand.u32 4294901760, %v8687_v1  ;;  %v8718_v31 = vsub.f32 %v90_v38, %v8700_v49  ;;  %v8794_v38 = vsub.f32 %v84_v5, %v8774_v8 }
  0x80   :  { %7390 = vmatprep.subr.mxu0 %v9814_v48  ;;  %7417 = vmatprep.subr.mxu1 %v9777_v44  ;;  %v9829_v44 = vld [vmem:[#allocation31_spill] sm:$0xff]  ;;  %v1085_v3 = vsub.f32 %v8698_v2, %v1084_v35  ;;  %v82_v48 = vld [vmem:[#allocation5 + $0x118] sm:$0xff] }
  0x81   :  { %7391 = vmatpush3.msra.mxu0 %v9815_v57  ;;  %7418 = vmatpush3.msra.mxu1 %v9778_v26  ;;  %v8705_v26 = vand.u32 4294901760, %v89_v33  ;;  %v1078_v40 = vsub.f32 %v8687_v1, %v1077_v23  ;;  %v9730_v4 = vand.u32 4294901760, %v8718_v31  ;;  %v8785_v57 = vsub.f32 %v85_v59, %v8763_v11 }
  0x82   :  { %7392 = vmatprep.subr.mxu0 %v9816_v36  ;;  %7419 = vmatprep.subr.mxu1 %v9779_v47  ;;  %v88_v47 = vld [vmem:[#allocation5 + $0x148] sm:$0xff]  ;;  %v1086_v16 = vand.u32 4294901760, %v1085_v3  ;;  %v8787_v36 = vand.u32 4294901760, %v83_v15 }
  0x83   :  { %7393 = vmatpush3.msra.mxu0 %v9817_v55  ;;  %7420 = vmatpush3.msra.mxu1 %v9780_v7  ;;  %v8035_v7 = vmov 0.0   ;;  %v8723_v62 = vand.u32 4294901760, %v88_v47  ;;  %v1079_v9 = vand.u32 4294901760, %v1078_v40  ;;  %v1099_v17 = vsub.f32 %v8718_v31, %v9730_v4  ;;  %v81_v55 = vld [vmem:[#allocation5 + $0x110] sm:$0xff] }
  0x84   :  { %7394 = vmatprep.subr.mxu0 %v9818_v37  ;;  %7421 = vmatprep.subr.mxu1 %v9781_v39  ;;  %v9827_v39 = vld [vmem:[#allocation30_spill] sm:$0xff]  ;;  %v9722_v61 = vand.u32 4294901760, %v8785_v57 }
  0x85   :  { %7395 = vmatpush3.msra.mxu0 %v9820_v32  ;;  %7422 = vmatpush3.msra.mxu1 %v9821_v52  ;;  %v8746_v0 = vsub.f32 %v88_v47, %v8723_v62  ;;  %v1100_v37 = vand.u32 4294901760, %v1099_v17  ;;  %v8799_v32 = vand.u32 4294901760, %v82_v48 }
  0x86   :  { %7396 = vmatprep.subr.mxu0 %v9823_v53  ;;  %7423 = vmatprep.subr.mxu1 %v9824_v20  ;;  %v8808_v53 = vsub.f32 %v83_v15, %v8787_v36  ;;  %v8810_v20 = vand.u32 4294901760, %v81_v55 }
  0x87   :  { %7397 = vmatpush3.msra.mxu0 %v9826_v51  ;;  %855 = vmatprep.mubr.f32.mxu0 %v9827_v39  ;;  %v9727_v22 = vand.u32 4294901760, %v8746_v0  ;;  %v46_v51 = vld [vmem:[%s9648_s1 + $0x18] sm:$0xff]  ;;  %v8823_v47 = vsub.f32 %v82_v48, %v8799_v32  ;;  %v98_v48 = vld [vmem:[#allocation5 + $0x198] sm:$0xff]  ;;  %s8036_s1 = smov 124  }
  0x88   :  { %7424 = vmatpush3.msra.mxu1 %v9828_v34  ;;  %857 = vmatmul.mubr.f32.vlgmr.msra.gmra.mxu0 %v9829_v44  ;;  %v79_v34 = vld [vmem:[#allocation5 + $0x100] sm:$0xff]  ;;  %v102_v40 = vsel %vm100_vm0, %v46_v51, 0  ;;  %v8832_v59 = vsub.f32 %v81_v55, %v8810_v20  ;;  %v9720_v5 = vand.u32 4294901760, %v8808_v53  ;;  %v97_v51 = vld [vmem:[#allocation5 + $0x190] sm:$0xff] }
  0x89   :  { %7425 = vmatprep.subr.mxu1 %v8318_v19  ;;  %966 = vmatprep.subr.mxu0 %v8035_v7  ;;  %v1071_v19 = vsub.f32 %v8676_v58, %v1070_v43  ;;  %v1113_v30 = vsub.f32 %v8746_v0, %v9727_v22  ;;  %v8837_v3 = vand.u32 4294901760, %v79_v34 }
  0x8a   :  { %7426 = vmatpush3.msra.mxu1 %v9785_v21  ;;  %968 = vmatpush1.msra.mxu0 %v8659_v42  ;;  %v8729_v21 = vsub.f32 %v89_v33, %v8705_v26 }
  0x8b   :  { %7427 = vmatprep.subr.mxu1 %v9787_v56  ;;  %969 = vmatprep.subr.mxu0 %v8035_v7  ;;  %v8731_v56 = vand.u32 4294901760, %v87_v25 }
  0x8c   :  { %7428 = vmatpush3.msra.mxu1 %v9789_v46  ;;  %971 = vmatpush1.msra.mxu0 %v8667_v63  ;;  %v8741_v46 = vand.u32 4294901760, %v86_v14 }
  0x8d   :  { %7429 = vmatprep.subr.mxu1 %v9791_v27  ;;  %972 = vmatprep.subr.mxu0 %v8035_v7  ;;  %v1072_v27 = vand.u32 4294901760, %v1071_v19  ;;  %v9721_v19 = vand.u32 4294901760, %v8794_v38 }
  0x8e   :  { %7430 = vmatpush3.msra.mxu1 %v8384_v28  ;;  %974 = vmatpush1.msra.mxu0 %v8678_v50  ;;  %v8755_v28 = vsub.f32 %v87_v25, %v8731_v56  ;;  %v8825_v25 = vand.u32 4294901760, %v80_v29 }
  0x8f   :  { %7431 = vmatprep.subr.mxu1 %v8398_v41  ;;  %975 = vmatprep.subr.mxu0 %v8035_v7  ;;  %v9729_v41 = vand.u32 4294901760, %v8729_v21  ;;  %v1141_v17 = vsub.f32 %v8794_v38, %v9721_v19 }
  0x90   :  { %7432 = vmatpush3.msra.mxu1 %v8420_v12  ;;  %959 = vmatprep.mubr.f32.mxu1 %v9827_v39  ;;  %v8768_v12 = vsub.f32 %v86_v14, %v8741_v46  ;;  %v9726_v60 = vand.u32 4294901760, %v8755_v28 }
  0x91   :  { %977 = vmatpush1.msra.mxu0 %v8689_v13  ;;  %961 = vmatmul.mubr.f32.vlgmr.msra.gmra.mxu1 %v9829_v44  ;;  %v1106_v24 = vsub.f32 %v8729_v21, %v9729_v41  ;;  %v1114_v44 = vand.u32 4294901760, %v1113_v30 }
  0x92   :  { %978 = vmatprep.subr.mxu0 %v8035_v7  ;;  %1067 = vmatprep.subr.mxu1 %v8035_v7  ;;  %v9724_v6 = vand.u32 4294901760, %v8768_v12  ;;  %v1120_v33 = vsub.f32 %v8755_v28, %v9726_v60 }
  0x93   :  { %980 = vmatpush1.msra.mxu0 %v8700_v49  ;;  %1073 = vmatpush1.msra.mxu1 %v1072_v27  ;;  %v1107_v52 = vand.u32 4294901760, %v1106_v24  ;;  %v1134_v27 = vsub.f32 %v8785_v57, %v9722_v61  ;;  %v9723_v24 = vand.u32 4294901760, %v8823_v47  ;;  %v8886_v61 = vand.u32 4294901760, %v97_v51 }
  0x94   :  { %981 = vmatprep.subr.mxu0 %v8035_v7  ;;  %1074 = vmatprep.subr.mxu1 %v8035_v7  ;;  %v1127_v39 = vsub.f32 %v8768_v12, %v9724_v6  ;;  %v1121_v14 = vand.u32 4294901760, %v1120_v33  ;;  %v1148_v33 = vsub.f32 %v8808_v53, %v9720_v5  ;;  %v95_v6 = vld [vmem:[#allocation5 + $0x180] sm:$0xff] }
  0x95   :  { %983 = vmatpush1.msra.mxu0 %v8705_v26  ;;  %1080 = vmatpush1.msra.mxu1 %v1079_v9  ;;  %v99_v9 = vld [vmem:[#allocation5 + $0x1a0] sm:$0xff]  ;;  %v1135_v30 = vand.u32 4294901760, %v1134_v27  ;;  %v96_v27 = vld [vmem:[#allocation5 + $0x188] sm:$0xff]  ;;  %v8911_v60 = vsub.f32 %v97_v51, %v8886_v61 }
  0x96   :  { %984 = vmatprep.subr.mxu0 %v8035_v7  ;;  %1081 = vmatprep.subr.mxu1 %v8035_v7  ;;  %v1128_v15 = vand.u32 4294901760, %v1127_v39  ;;  %v8857_v55 = vand.u32 4294901760, %v99_v9  ;;  %v8871_v39 = vand.u32 4294901760, %v98_v48 }
  0x97   :  { %986 = vmatpush1.msra.mxu0 %v8723_v62  ;;  %1087 = vmatpush1.msra.mxu1 %v1086_v16  ;;  %v8847_v16 = vsub.f32 %v80_v29, %v8825_v25  ;;  %v9725_v29 = vand.u32 4294901760, %v8832_v59 }
  0x98   :  { %987 = vmatprep.subr.mxu0 %v8035_v7  ;;  %1088 = vmatprep.subr.mxu1 %v8035_v7  ;;  %v8884_v19 = vsub.f32 %v99_v9, %v8857_v55  ;;  %v8899_v9 = vsub.f32 %v98_v48, %v8871_v39  ;;  %v8913_v48 = vand.u32 4294901760, %v95_v6 }
  0x99   :  { %989 = vmatpush1.msra.mxu0 %v8731_v56  ;;  %1094 = vmatpush1.msra.mxu1 %v1093_v54  ;;  %v8853_v54 = vand.u32 4294901760, %v102_v40 }
  0x9a   :  { %990 = vmatprep.subr.mxu0 %v8035_v7  ;;  %1095 = vmatprep.subr.mxu1 %v8035_v7  ;;  %v9732_v22 = vand.u32 4294901760, %v8884_v19  ;;  %v1211_v41 = vand.u32 4294901760, %v8899_v9 }
  0x9b   :  { %992 = vmatpush1.msra.mxu0 %v8741_v46  ;;  %1101 = vmatpush1.msra.mxu1 %v1100_v37  ;;  %v8859_v37 = vand.u32 4294901760, %v45_v10  ;;  %v8879_v5 = vsub.f32 %v102_v40, %v8853_v54  ;;  %v1162_v40 = vsub.f32 %v8832_v59, %v9725_v29 }
  0x9c   :  { %993 = vmatprep.subr.mxu0 %v8035_v7  ;;  %1102 = vmatprep.subr.mxu1 %v8035_v7 }
  0x9d   :  { %995 = vmatpush1.msra.mxu0 %v8763_v11  ;;  %1108 = vmatpush1.msra.mxu1 %v1107_v52  ;;  %v8863_v52 = vsub.f32 %v79_v34, %v8837_v3  ;;  %v1155_v34 = vsub.f32 %v8823_v47, %v9723_v24  ;;  %v9735_v29 = vand.u32 4294901760, %v8879_v5 }
  0x9e   :  { %996 = vmatprep.subr.mxu0 %v8035_v7  ;;  %1109 = vmatprep.subr.mxu1 %v8035_v7 }
  0x9f   :  { %998 = vmatpush1.msra.mxu0 %v8774_v8  ;;  %1115 = vmatpush1.msra.mxu1 %v1114_v44  ;;  %v1142_v44 = vand.u32 4294901760, %v1141_v17  ;;  %v1149_v17 = vand.u32 4294901760, %v1148_v33  ;;  %v9731_v24 = vand.u32 4294901760, %v8863_v52 }
  0xa0   :  { %999 = vmatprep.subr.mxu0 %v8035_v7  ;;  %1116 = vmatprep.subr.mxu1 %v8035_v7 }
  0xa1   :  { %1001 = vmatpush1.msra.mxu0 %v8787_v36  ;;  %1122 = vmatpush1.msra.mxu1 %v1121_v14  ;;  %v9728_v14 = vand.u32 4294901760, %v8847_v16 }
  0xa2   :  { %1002 = vmatprep.subr.mxu0 %v8035_v7  ;;  %1123 = vmatprep.subr.mxu1 %v8035_v7 }
  0xa3   :  { %1004 = vmatpush1.msra.mxu0 %v8799_v32  ;;  %1129 = vmatpush1.msra.mxu1 %v1128_v15  ;;  %v8889_v15 = vsub.f32 %v45_v10, %v8859_v37  ;;  %v8901_v10 = vand.u32 4294901760, %v96_v27  ;;  %v1169_v33 = vsub.f32 %v8847_v16, %v9728_v14  ;;  %v1176_v14 = vsub.f32 %v8863_v52, %v9731_v24 }
  0xa4   :  { %1005 = vmatprep.subr.mxu0 %v8035_v7  ;;  %1130 = vmatprep.subr.mxu1 %v8035_v7 }
  0xa5   :  { %1007 = vmatpush1.msra.mxu0 %v8810_v20  ;;  %1136 = vmatpush1.msra.mxu1 %v1135_v30  ;;  %v1156_v30 = vand.u32 4294901760, %v1155_v34  ;;  %v1163_v34 = vand.u32 4294901760, %v1162_v40  ;;  %v8924_v51 = vsub.f32 %v96_v27, %v8901_v10  ;;  %v1170_v4 = vand.u32 4294901760, %v1169_v33 }
  0xa6   :  { %1008 = vmatprep.subr.mxu0 %v8035_v7  ;;  %1137 = vmatprep.subr.mxu1 %v8035_v7  ;;  %v8934_v40 = vsub.f32 %v95_v6, %v8913_v48  ;;  %v1205_v27 = vsub.f32 %v8884_v19, %v9732_v22  ;;  %v1218_v33 = vand.u32 4294901760, %v8911_v60  ;;  %v1177_v24 = vand.u32 4294901760, %v1176_v14 }
  0xa7   :  { %1010 = vmatpush1.msra.mxu0 %v8825_v25  ;;  %1143 = vmatpush1.msra.mxu1 %v1142_v44  ;;  %v9733_v44 = vand.u32 4294901760, %v8889_v15  ;;  %v1212_v6 = vsub.f32 %v8899_v9, %v1211_v41  ;;  %v1225_v22 = vand.u32 4294901760, %v8924_v51 }
  0xa8   :  { %1011 = vmatprep.subr.mxu0 %v8035_v7  ;;  %1144 = vmatprep.subr.mxu1 %v8035_v7  ;;  %v1219_v45 = vsub.f32 %v8911_v60, %v1218_v33 }
  0xa9   :  { %1013 = vmatpush1.msra.mxu0 %v8837_v3  ;;  %1150 = vmatpush1.msra.mxu1 %v1149_v17  ;;  %v1054_v17 = vsub.f32 %v8879_v5, %v9735_v29  ;;  %v1232_v29 = vand.u32 4294901760, %v8934_v40 }
  0xaa   :  { %1036 = vmatprep.subr.mxu0 %v8035_v7  ;;  %1151 = vmatprep.subr.mxu1 %v8035_v7 }
  0xab   :  { %1038 = vmatpush2.msra.mxu0 %v8857_v55  ;;  %1157 = vmatpush1.msra.mxu1 %v1156_v30  ;;  %v1060_v30 = vsub.f32 %v8889_v15, %v9733_v44  ;;  %v1055_v44 = vand.u32 4294901760, %v1054_v17  ;;  %v1226_v17 = vsub.f32 %v8924_v51, %v1225_v22 }
  0xac   :  { %1039 = vmatprep.subr.mxu0 %v8035_v7  ;;  %1158 = vmatprep.subr.mxu1 %v8035_v7 }
  0xad   :  { %1041 = vmatpush2.msra.mxu0 %v8871_v39  ;;  %1164 = vmatpush1.msra.mxu1 %v1163_v34  ;;  %v1206_v34 = vand.u32 4294901760, %v1205_v27  ;;  %v1061_v14 = vand.u32 4294901760, %v1060_v30  ;;  %v1220_v27 = vand.u32 4294901760, %v1219_v45  ;;  %v1233_v30 = vsub.f32 %v8934_v40, %v1232_v29 }
  0xae   :  { %1042 = vmatprep.subr.mxu0 %v8035_v7  ;;  %1165 = vmatprep.subr.mxu1 %v8035_v7 }
  0xaf   :  { %1044 = vmatpush2.msra.mxu0 %v8886_v61  ;;  %1171 = vmatpush1.msra.mxu1 %v1170_v4  ;;  %v1213_v4 = vand.u32 4294901760, %v1212_v6  ;;  %v1234_v45 = vand.u32 4294901760, %v1233_v30 }
  0xb0   :  { %1045 = vmatprep.subr.mxu0 %v8035_v7  ;;  %1172 = vmatprep.subr.mxu1 %v8035_v7 }
  0xb1   :  { %1047 = vmatpush2.msra.mxu0 %v8901_v10  ;;  %1178 = vmatpush1.msra.mxu1 %v1177_v24  ;;  %v1227_v24 = vand.u32 4294901760, %v1226_v17 }
  0xb2   :  { %1048 = vmatprep.subr.mxu0 %v8035_v7  ;;  %1201 = vmatprep.subr.mxu1 %v8035_v7 }
  0xb3   :  { %1050 = vmatpush2.msra.mxu0 %v8913_v48  ;;  %1056 = vmatprep.mubr.f32.mxu0 %v1055_v44 }
  0xb4   :  { %1207 = vmatpush2.msra.mxu1 %v1206_v34  ;;  %1062 = vmatmul.mubr.f32.vlgmr.msra.gmra.mxu0 %v1061_v14 }
  0xb5   :  { %1208 = vmatprep.subr.mxu1 %v8035_v7  ;;  %1244 = vmatprep.subr.mxu0 %v8035_v7 }
  0xb6   :  { %1214 = vmatpush2.msra.mxu1 %v1213_v4  ;;  %1247 = vmatpush1.msra.mxu0 %v8676_v58  ;;  %v9830_v58 = vand.u32 4294901760, %v8879_v5 }
  0xb7   :  { %1215 = vmatprep.subr.mxu1 %v8035_v7  ;;  %1248 = vmatprep.subr.mxu0 %v8035_v7 }
  0xb8   :  { %1221 = vmatpush2.msra.mxu1 %v1220_v27  ;;  %1251 = vmatpush1.msra.mxu0 %v8687_v1  ;;  %v9831_v1 = vand.u32 4294901760, %v8710_v18 }
  0xb9   :  { %1222 = vmatprep.subr.mxu1 %v8035_v7  ;;  %1252 = vmatprep.subr.mxu0 %v8035_v7 }
  0xba   :  { %1228 = vmatpush2.msra.mxu1 %v1227_v24  ;;  %1255 = vmatpush1.msra.mxu0 %v8698_v2  ;;  %v9833_v2 = vand.u32 4294901760, %v8718_v31 }
  0xbb   :  { %1229 = vmatprep.subr.mxu1 %v8035_v7  ;;  %1256 = vmatprep.subr.mxu0 %v8035_v7 }
  0xbc   :  { %1235 = vmatpush2.msra.mxu1 %v1234_v45  ;;  %1237 = vmatprep.mubr.f32.mxu1 %v8853_v54 }
  0xbd   :  { %1259 = vmatpush1.msra.mxu0 %v8710_v18  ;;  %1239 = vmatmul.mubr.f32.vlgmr.msra.gmra.mxu1 %v8859_v37  ;;  %v9835_v18 = vand.u32 4294901760, %v8746_v0 }
  0xbe   :  { %1260 = vmatprep.subr.mxu0 %v8035_v7  ;;  %1360 = vmatprep.subr.mxu1 %v8035_v7 }
  0xbf   :  { %1263 = vmatpush1.msra.mxu0 %v8718_v31  ;;  %1362 = vmatpush1.msra.mxu1 %v8659_v42  ;;  %v9842_v31 = vand.u32 4294901760, %v8832_v59 }
  0xc0   :  { %1264 = vmatprep.subr.mxu0 %v8035_v7  ;;  %1363 = vmatprep.subr.mxu1 %v8035_v7 }
  0xc1   :  { %1267 = vmatpush1.msra.mxu0 %v8729_v21  ;;  %1365 = vmatpush1.msra.mxu1 %v8667_v63 }
  0xc2   :  { %1268 = vmatprep.subr.mxu0 %v8035_v7  ;;  %1366 = vmatprep.subr.mxu1 %v8035_v7 }
  0xc3   :  { %1271 = vmatpush1.msra.mxu0 %v8746_v0  ;;  %1368 = vmatpush1.msra.mxu1 %v8678_v50 }
  0xc4   :  { %1272 = vmatprep.subr.mxu0 %v8035_v7  ;;  %1369 = vmatprep.subr.mxu1 %v8035_v7 }
  0xc5   :  { %1275 = vmatpush1.msra.mxu0 %v8755_v28  ;;  %1371 = vmatpush1.msra.mxu1 %v8689_v13 }
  0xc6   :  { %1276 = vmatprep.subr.mxu0 %v8035_v7  ;;  %1372 = vmatprep.subr.mxu1 %v8035_v7 }
  0xc7   :  { %1279 = vmatpush1.msra.mxu0 %v8768_v12  ;;  %1374 = vmatpush1.msra.mxu1 %v8700_v49 }
  0xc8   :  { %1280 = vmatprep.subr.mxu0 %v8035_v7  ;;  %1375 = vmatprep.subr.mxu1 %v8035_v7 }
  0xc9   :  { %1283 = vmatpush1.msra.mxu0 %v8785_v57  ;;  %1377 = vmatpush1.msra.mxu1 %v8705_v26 }
  0xca   :  { %1284 = vmatprep.subr.mxu0 %v8035_v7  ;;  %1378 = vmatprep.subr.mxu1 %v8035_v7 }
  0xcb   :  { %1287 = vmatpush1.msra.mxu0 %v8794_v38  ;;  %1380 = vmatpush1.msra.mxu1 %v8723_v62 }
  0xcc   :  { %1288 = vmatprep.subr.mxu0 %v8035_v7  ;;  %1381 = vmatprep.subr.mxu1 %v8035_v7 }
  0xcd   :  { %1291 = vmatpush1.msra.mxu0 %v8808_v53  ;;  %1383 = vmatpush1.msra.mxu1 %v8731_v56 }
  0xce   :  { %1292 = vmatprep.subr.mxu0 %v8035_v7  ;;  %1384 = vmatprep.subr.mxu1 %v8035_v7 }
  0xcf   :  { %1295 = vmatpush1.msra.mxu0 %v8823_v47  ;;  %1386 = vmatpush1.msra.mxu1 %v8741_v46 }
  0xd0   :  { %1296 = vmatprep.subr.mxu0 %v8035_v7  ;;  %1387 = vmatprep.subr.mxu1 %v8035_v7 }
  0xd1   :  { %1299 = vmatpush1.msra.mxu0 %v8832_v59  ;;  %1389 = vmatpush1.msra.mxu1 %v8763_v11 }
  0xd2   :  { %1300 = vmatprep.subr.mxu0 %v8035_v7  ;;  %1390 = vmatprep.subr.mxu1 %v8035_v7 }
  0xd3   :  { %1303 = vmatpush1.msra.mxu0 %v8847_v16  ;;  %1392 = vmatpush1.msra.mxu1 %v8774_v8 }
  0xd4   :  { %1304 = vmatprep.subr.mxu0 %v8035_v7  ;;  %1393 = vmatprep.subr.mxu1 %v8035_v7 }
  0xd5   :  { %1307 = vmatpush1.msra.mxu0 %v8863_v52  ;;  %1395 = vmatpush1.msra.mxu1 %v8787_v36 }
  0xd6   :  { %1330 = vmatprep.subr.mxu0 %v8035_v7  ;;  %1396 = vmatprep.subr.mxu1 %v8035_v7 }
  0xd7   :  { %1333 = vmatpush2.msra.mxu0 %v8884_v19  ;;  %1398 = vmatpush1.msra.mxu1 %v8799_v32 }
  0xd8   :  { %1334 = vmatprep.subr.mxu0 %v8035_v7  ;;  %1399 = vmatprep.subr.mxu1 %v8035_v7 }
  0xd9   :  { %1337 = vmatpush2.msra.mxu0 %v8899_v9  ;;  %1401 = vmatpush1.msra.mxu1 %v8810_v20 }
  0xda   :  { %1338 = vmatprep.subr.mxu0 %v8035_v7  ;;  %1402 = vmatprep.subr.mxu1 %v8035_v7 }
  0xdb   :  { %1341 = vmatpush2.msra.mxu0 %v8911_v60  ;;  %1404 = vmatpush1.msra.mxu1 %v8825_v25 }
  0xdc   :  { %1342 = vmatprep.subr.mxu0 %v8035_v7  ;;  %1405 = vmatprep.subr.mxu1 %v8035_v7 }
  0xdd   :  { %1345 = vmatpush2.msra.mxu0 %v8924_v51  ;;  %1407 = vmatpush1.msra.mxu1 %v8837_v3 }
  0xde   :  { %1346 = vmatprep.subr.mxu0 %v8035_v7  ;;  %1430 = vmatprep.subr.mxu1 %v8035_v7 }
  0xdf   :  { %1349 = vmatpush2.msra.mxu0 %v8934_v40  ;;  %1352 = vmatprep.mubr.f32.mxu0 %v8879_v5 }
  0xe0   :  { %1432 = vmatpush2.msra.mxu1 %v8857_v55  ;;  %1355 = vmatmul.mubr.f32.vlgmr.msra.gmra.mxu0 %v8889_v15 }
  0xe1   :  { %1433 = vmatprep.subr.mxu1 %v8035_v7  ;;  %1457 = vmatprep.subr.mxu0 %v8035_v7 }
  0xe2   :  { %1435 = vmatpush2.msra.mxu1 %v8871_v39  ;;  %1461 = vmatpush1.msra.mxu0 %v1070_v43  ;;  %v9832_v43 = vand.u32 4294901760, %v8889_v15 }
  0xe3   :  { %1436 = vmatprep.subr.mxu1 %v8035_v7  ;;  %1462 = vmatprep.subr.mxu0 %v8035_v7 }
  0xe4   :  { %1438 = vmatpush2.msra.mxu1 %v8886_v61  ;;  %1466 = vmatpush1.msra.mxu0 %v1077_v23  ;;  %v9834_v23 = vand.u32 4294901760, %v8729_v21  ;;  %v9845_v21 = vand.u32 4294901760, %v8884_v19  ;;  %v1686_v19 = vld [vmem:[#allocation2] sm:$0xff] }
  0xe5   :  { %1439 = vmatprep.subr.mxu1 %v8035_v7  ;;  %1467 = vmatprep.subr.mxu0 %v8035_v7  ;;  %v1689_v44 = vsel %vm1687_vm2, %v1686_v19, 0 }
  0xe6   :  { %1441 = vmatpush2.msra.mxu1 %v8901_v10  ;;  %1471 = vmatpush1.msra.mxu0 %v1084_v35  ;;  %v9844_v35 = vand.u32 4294901760, %v8863_v52  ;;  %v1761_v51 = vand.u32 4294901760, %v1689_v44 }
  0xe7   :  { %1442 = vmatprep.subr.mxu1 %v8035_v7  ;;  %1472 = vmatprep.subr.mxu0 %v8035_v7 }
  0xe8   :  { %1444 = vmatpush2.msra.mxu1 %v8913_v48  ;;  %1448 = vmatprep.mubr.f32.mxu1 %v9830_v58 }
  0xe9   :  { %1476 = vmatpush1.msra.mxu0 %v9831_v1  ;;  %1452 = vmatmul.mubr.f32.vlgmr.msra.gmra.mxu1 %v9832_v43 }
  0xea   :  { %1477 = vmatprep.subr.mxu0 %v8035_v7  ;;  %1592 = vmatprep.subr.mxu1 %v8035_v7 }
  0xeb   :  { %1481 = vmatpush1.msra.mxu0 %v9833_v2  ;;  %1594 = vmatpush1.msra.mxu1 %v8659_v42  ;;  %v9836_v42 = vand.u32 4294901760, %v8755_v28 }
  0xec   :  { %1482 = vmatprep.subr.mxu0 %v8035_v7  ;;  %1595 = vmatprep.subr.mxu1 %v8035_v7 }
  0xed   :  { %1486 = vmatpush1.msra.mxu0 %v9834_v23  ;;  %1597 = vmatpush1.msra.mxu1 %v8667_v63  ;;  %v9837_v63 = vand.u32 4294901760, %v8768_v12 }
  0xee   :  { %1487 = vmatprep.subr.mxu0 %v8035_v7  ;;  %1598 = vmatprep.subr.mxu1 %v8035_v7 }
  0xef   :  { %1491 = vmatpush1.msra.mxu0 %v9835_v18  ;;  %1600 = vmatpush1.msra.mxu1 %v8678_v50  ;;  %v9838_v50 = vand.u32 4294901760, %v8785_v57 }
  0xf0   :  { %1492 = vmatprep.subr.mxu0 %v8035_v7  ;;  %1601 = vmatprep.subr.mxu1 %v8035_v7 }
  0xf1   :  { %1496 = vmatpush1.msra.mxu0 %v9836_v42  ;;  %1603 = vmatpush1.msra.mxu1 %v8689_v13  ;;  %v9839_v13 = vand.u32 4294901760, %v8794_v38 }
  0xf2   :  { %1497 = vmatprep.subr.mxu0 %v8035_v7  ;;  %1604 = vmatprep.subr.mxu1 %v8035_v7 }
  0xf3   :  { %1501 = vmatpush1.msra.mxu0 %v9837_v63  ;;  %1606 = vmatpush1.msra.mxu1 %v8700_v49  ;;  %v9840_v49 = vand.u32 4294901760, %v8808_v53 }
  0xf4   :  { %1502 = vmatprep.subr.mxu0 %v8035_v7  ;;  %1607 = vmatprep.subr.mxu1 %v8035_v7 }
  0xf5   :  { %1506 = vmatpush1.msra.mxu0 %v9838_v50  ;;  %1609 = vmatpush1.msra.mxu1 %v8705_v26  ;;  %v9841_v26 = vand.u32 4294901760, %v8823_v47 }
  0xf6   :  { %1507 = vmatprep.subr.mxu0 %v8035_v7  ;;  %1610 = vmatprep.subr.mxu1 %v8035_v7 }
  0xf7   :  { %1511 = vmatpush1.msra.mxu0 %v9839_v13  ;;  %1612 = vmatpush1.msra.mxu1 %v8723_v62  ;;  %v9843_v62 = vand.u32 4294901760, %v8847_v16 }
  0xf8   :  { %1512 = vmatprep.subr.mxu0 %v8035_v7  ;;  %1613 = vmatprep.subr.mxu1 %v8035_v7 }
  0xf9   :  { %1516 = vmatpush1.msra.mxu0 %v9840_v49  ;;  %1615 = vmatpush1.msra.mxu1 %v8731_v56 }
  0xfa   :  { %1517 = vmatprep.subr.mxu0 %v8035_v7  ;;  %1616 = vmatprep.subr.mxu1 %v8035_v7 }
  0xfb   :  { %1521 = vmatpush1.msra.mxu0 %v9841_v26  ;;  %1618 = vmatpush1.msra.mxu1 %v8741_v46 }
  0xfc   :  { %1522 = vmatprep.subr.mxu0 %v8035_v7  ;;  %1619 = vmatprep.subr.mxu1 %v8035_v7 }
  0xfd   :  { %1526 = vmatpush1.msra.mxu0 %v9842_v31  ;;  %1621 = vmatpush1.msra.mxu1 %v8763_v11 }
  0xfe   :  { %1527 = vmatprep.subr.mxu0 %v8035_v7  ;;  %1622 = vmatprep.subr.mxu1 %v8035_v7 }
  0xff   :  { %1531 = vmatpush1.msra.mxu0 %v9843_v62  ;;  %1624 = vmatpush1.msra.mxu1 %v8774_v8 }
 0x100   :  { %1532 = vmatprep.subr.mxu0 %v8035_v7  ;;  %1625 = vmatprep.subr.mxu1 %v8035_v7 }
 0x101   :  { %1536 = vmatpush1.msra.mxu0 %v9844_v35  ;;  %1627 = vmatpush1.msra.mxu1 %v8787_v36 }
 0x102   :  { %1559 = vmatprep.subr.mxu0 %v8035_v7  ;;  %1628 = vmatprep.subr.mxu1 %v8035_v7 }
 0x103   :  { %1563 = vmatpush2.msra.mxu0 %v9845_v21  ;;  %1630 = vmatpush1.msra.mxu1 %v8799_v32 }
 0x104   :  { %1564 = vmatprep.subr.mxu0 %v8035_v7  ;;  %1631 = vmatprep.subr.mxu1 %v8035_v7 }
 0x105   :  { %1568 = vmatpush2.msra.mxu0 %v1211_v41  ;;  %1633 = vmatpush1.msra.mxu1 %v8810_v20  ;;  %v7258_v56 = vpop.f32.mrf.mxu0 }
 0x106   :  { %1569 = vmatprep.subr.mxu0 %v8035_v7  ;;  %1634 = vmatprep.subr.mxu1 %v8035_v7 }
 0x107   :  { %1573 = vmatpush2.msra.mxu0 %v1218_v33  ;;  %1636 = vmatpush1.msra.mxu1 %v8825_v25  ;;  %v7259_v46 = vpop.f32.mrf.mxu0  ;;  %v1762_v33 = vsub.f32 %v1689_v44, %v1761_v51 }
 0x108   :  { %1574 = vmatprep.subr.mxu0 %v8035_v7  ;;  %1637 = vmatprep.subr.mxu1 %v8035_v7  ;;  %v7260_v0 = vadd.f32 %v7259_v46, %v7258_v56 }
 0x109   :  { %1578 = vmatpush2.msra.mxu0 %v1225_v22  ;;  %1639 = vmatpush1.msra.mxu1 %v8837_v3  ;;  %v1763_v14 = vand.u32 4294901760, %v1762_v33 }
 0x10a   :  { %1579 = vmatprep.subr.mxu0 %v8035_v7  ;;  %1662 = vmatprep.subr.mxu1 %v8035_v7 }
 0x10b   :  { %1583 = vmatpush2.msra.mxu0 %v1232_v29  ;;  %1585 = vmatprep.mubr.f32.mxu0 %v8853_v54  ;;  %v1764_v27 = vsub.f32 %v1762_v33, %v1763_v14 }
 0x10c   :  { %1664 = vmatpush2.msra.mxu1 %v8857_v55  ;;  %1587 = vmatmul.mubr.f32.vlgmr.msra.gmra.mxu0 %v8859_v37 }
 0x10d   :  { %1665 = vmatprep.subr.mxu1 %v8035_v7  ;;  %1678 = vmatprep.mubr.f32.mxu1 %v8853_v54  ;;  %v1765_v1 = vand.u32 4294901760, %v1764_v27 }
 0x10e   :  { %1667 = vmatpush2.msra.mxu1 %v8871_v39  ;;  %v7293_v28 = vpop.f32.mrf.mxu1  ;;  %7580 = vmatprep.subr.mxu0 %v8035_v7 }
 0x10f   :  { %1668 = vmatprep.subr.mxu1 %v8035_v7  ;;  %2150 = vrot.lane.b32.xlu0 %v1686_v19, %s8036_s1 }
 0x110   :  { %1670 = vmatpush2.msra.mxu1 %v8886_v61  ;;  %v7294_v41 = vpop.f32.mrf.mxu1  ;;  %2609 = vrot.lane.b32.xlu1 %v1686_v19, %s8037_s7 }
 0x111   :  { %1671 = vmatprep.subr.mxu1 %v8035_v7  ;;  %v7295_v11 = vadd.f32 %v7294_v41, %v7293_v28  ;;  %7582 = vmatprep.mubr.msk.f32.mxu0 %vm8038_vm1, %v8035_v7 }
 0x112   :  { %1673 = vmatpush2.msra.mxu1 %v8901_v10 }
 0x113   :  { %1674 = vmatprep.subr.mxu1 %v8035_v7  ;;  %v445_v12 = vadd.f32 %v7295_v11, %v7260_v0 }
 0x114   :  { %1676 = vmatpush2.msra.mxu1 %v8913_v48 }
 0x115   :  { %1680 = vmatmul.mubr.f32.vlgmr.msra.gmra.mxu1 %v8859_v37  ;;  %7585 = vmatprep.subr.mxu1 %v8035_v7 }
 0x116   :  { %7587 = vmatprep.mubr.msk.f32.mxu1 %vm8038_vm1, %v8035_v7 }
 0x126   :  { %v7328_v8 = vpop.f32.mrf.mxu0 }
 0x128   :  { %v7329_v22 = vpop.f32.mrf.mxu0 }
 0x129   :  { %v7330_v60 = vadd.f32 %v7329_v22, %v7328_v8 }
 0x12b   :  { %v583_v57 = vadd.f32 %v7330_v60, %v445_v12 }
 0x12f   :  { %v7363_v36 = vpop.f32.mrf.mxu1 }
 0x131   :  { %v7364_v38 = vpop.f32.mrf.mxu1 }
 0x132   :  { %v7365_v32 = vadd.f32 %v7364_v38, %v7363_v36 }
 0x134   :  { %v691_v53 = vadd.f32 %v7365_v32, %v583_v57 }
 0x148   :  { %v7398_v20 = vpop.f32.mrf.mxu0 }
 0x14a   :  { %v7399_v61 = vpop.f32.mrf.mxu0 }
 0x14b   :  { %v7400_v47 = vadd.f32 %v7399_v61, %v7398_v20 }
 0x14d   :  { %v859_v25 = vadd.f32 %v7400_v47, %v691_v53 }
 0x151   :  { %v7433_v59 = vpop.f32.mrf.mxu1 }
 0x153   :  { %v7434_v3 = vpop.f32.mrf.mxu1 }
 0x154   :  { %v7435_v5 = vadd.f32 %v7434_v3, %v7433_v59 }
 0x156   :  { %v963_v16 = vadd.f32 %v7435_v5, %v859_v25 }
 0x174   :  { %v1063_v54 = vpop.f32.mrf.mxu0 }
 0x175   :  { %v1064_v55 = vadd.f32 %v1063_v54, %v963_v16 }
 0x176   :  { %v1065_v37 = vpop.f32.mrf.mxu0 }
 0x17d   :  { %v1240_v52 = vpop.f32.mrf.mxu1 }
 0x17e   :  { %v1241_v29 = vadd.f32 %v1240_v52, %v1064_v55 }
 0x17f   :  { %v1242_v39 = vpop.f32.mrf.mxu1 }
 0x181   :  { %v2151_v63 = vpop.permute.xlu0 %2150 }
 0x182   :  { %v2154_v50 = vsel %vm1687_vm2, %v2151_v63, 0  ;;  %v2610_v31 = vpop.permute.xlu1 %2609 }
 0x183   :  { %v9213_v13 = vand.u32 4294901760, %v2154_v50  ;;  %v2613_v62 = vsel %vm1687_vm2, %v2610_v31, 0 }
 0x184   :  { %v9217_v21 = vand.u32 4294901760, %v2613_v62 }
 0x185   :  { %v2225_v49 = vsub.f32 %v2154_v50, %v9213_v13 }
 0x186   :  { %v9222_v11 = vsub.f32 %v2613_v62, %v9217_v21 }
 0x187   :  { %v2226_v26 = vand.u32 4294901760, %v2225_v49 }
 0x188   :  { %v2685_v60 = vand.u32 4294901760, %v9222_v11 }
 0x189   :  { %v2227_v35 = vsub.f32 %v2225_v49, %v2226_v26 }
 0x18a   :  { %v2686_v20 = vsub.f32 %v9222_v11, %v2685_v60 }
 0x18b   :  { %v2228_v0 = vand.u32 4294901760, %v2227_v35 }
 0x18c   :  { %v2687_v3 = vand.u32 4294901760, %v2686_v20 }
 0x1a0   :  { %v1356_v15 = vpop.f32.mrf.mxu0 }
 0x1a1   :  { %v1357_v34 = vadd.f32 %v1356_v15, %v1241_v29 }
 0x1a2   :  { %v1358_v9 = vpop.f32.mrf.mxu0 }
 0x1a9   :  { %v1453_v10 = vpop.f32.mrf.mxu1 }
 0x1aa   :  { %v1454_v4 = vadd.f32 %v1453_v10, %v1357_v34 }
 0x1ab   :  { %v1455_v48 = vpop.f32.mrf.mxu1 }
 0x1cc   :  { %v1588_v40 = vpop.f32.mrf.mxu0 }
 0x1cd   :  { %v1589_v17 = vadd.f32 %v1588_v40, %v1454_v4 }
 0x1ce   :  { %v1590_v6 = vpop.f32.mrf.mxu0 }
 0x1d5   :  { %v1681_v30 = vpop.f32.mrf.mxu1 }
 0x1d6   :  { %v9180_v24 = vadd.f32 %v1681_v30, %v1589_v17 }
 0x1d7   :  { %v1683_v45 = vpop.f32.mrf.mxu1 }
 0x1d8   :  { %1685 = vst [vmem:[%s9651_s4] sm:$0xff] %v9180_v24  ;;  %2611 = vrot.lane.b32.xlu1 %v9180_v24, %s8039_s10  ;;  %2152 = vrot.lane.b32.xlu0 %v9180_v24, %s8040_s11  ;;  %v1693_v58 = vsel %vm1691_vm3, %v9180_v24, 0  ;;  %s8042_s4 = smov 116   ;;  %v9265_v29 = vrot.slane %v9180_v24, 4 }
 0x1d9   :  { %v1726_v43 = vand.u32 4294901760, %v1693_v58 }
 0x1da   :  { %v3534_v9 = vsel %vm1691_vm3, %v9265_v29, 0 }
 0x1db   :  { %7581 = vmatpush3.msra.mxu0 %v1726_v43  ;;  %v1803_v2 = vsub.f32 %v1693_v58, %v1726_v43  ;;  %v9288_v44 = vand.u32 4294901760, %v3534_v9 }
 0x1dc   :  { %3070 = vrot.lane.b32.xlu1 %v9180_v24, %s8041_s12  ;;  %7583 = vmatmul.mubr.f32.vlgmr.msra.gmra.mxu0 %v1765_v1 }
 0x1dd   :  { %7590 = vmatprep.subr.mxu0 %v8035_v7  ;;  %7592 = vmatprep.mubr.msk.f32.mxu0 %vm8038_vm1, %v8035_v7  ;;  %v1804_v23 = vand.u32 4294901760, %v1803_v2  ;;  %v9300_v40 = vsub.f32 %v3534_v9, %v9288_v44 }
 0x1de   :  { %7591 = vmatpush3.msra.mxu0 %v1803_v2  ;;  %3068 = vrot.lane.b32.xlu0 %v1686_v19, %s8042_s4 }
 0x1df   :  { %7600 = vmatprep.subr.mxu0 %v8035_v7  ;;  %v1805_v18 = vsub.f32 %v1803_v2, %v1804_v23 }
 0x1e0   :  { %7593 = vmatmul.mubr.f32.vlgmr.msra.gmra.mxu0 %v1762_v33  ;;  %v3645_v33 = vand.u32 4294901760, %v9300_v40 }
 0x1e1   :  { %7601 = vmatpush3.msra.mxu0 %v1804_v23  ;;  %v1806_v42 = vand.u32 4294901760, %v1805_v18  ;;  %7602 = vmatprep.mubr.msk.f32.mxu0 %vm8038_vm1, %v8035_v7 }
 0x1e2   :  { %7610 = vmatprep.subr.mxu0 %v8035_v7  ;;  %v3646_v6 = vsub.f32 %v9300_v40, %v3645_v33 }
 0x1e3   :  { %7586 = vmatpush3.msra.mxu1 %v1806_v42 }
 0x1e4   :  { %7588 = vmatmul.mubr.f32.vlgmr.msra.gmra.mxu1 %v1761_v51  ;;  %7595 = vmatprep.subr.mxu1 %v8035_v7  ;;  %v3647_v34 = vand.u32 4294901760, %v3646_v6 }
 0x1e5   :  { %7596 = vmatpush3.msra.mxu1 %v1726_v43  ;;  %7597 = vmatprep.mubr.msk.f32.mxu1 %vm8038_vm1, %v8035_v7 }
 0x1e6   :  { %7605 = vmatprep.subr.mxu1 %v8035_v7  ;;  %7603 = vmatmul.mubr.f32.vlgmr.msra.gmra.mxu0 %v1761_v51 }
 0x1e7   :  { %7612 = vmatprep.mubr.msk.f32.mxu0 %vm8038_vm1, %v8035_v7 }
 0x1e8   :  { %7598 = vmatmul.mubr.f32.vlgmr.msra.gmra.mxu1 %v1763_v14 }
 0x1e9   :  { %7606 = vmatpush3.msra.mxu1 %v1726_v43  ;;  %7607 = vmatprep.mubr.msk.f32.mxu1 %vm8038_vm1, %v8035_v7 }
 0x1ea   :  { %7615 = vmatprep.subr.mxu1 %v8035_v7 }
 0x1ec   :  { %7608 = vmatmul.mubr.f32.vlgmr.msra.gmra.mxu1 %v1761_v51 }
 0x1ed   :  { %7617 = vmatprep.mubr.msk.f32.mxu1 %vm8038_vm1, %v8035_v7 }
 0x24a   :  { %v2612_v56 = vpop.permute.xlu1 %2611  ;;  %v2153_v46 = vpop.permute.xlu0 %2152 }
 0x24b   :  { %v2615_v28 = vsel %vm1691_vm3, %v2612_v56, 0  ;;  %v2156_v41 = vsel %vm1691_vm3, %v2153_v46, 0 }
 0x24c   :  { %v2189_v12 = vand.u32 4294901760, %v2156_v41  ;;  %v9224_v8 = vand.u32 4294901760, %v2615_v28 }
 0x24e   :  { %v2266_v22 = vsub.f32 %v2156_v41, %v2189_v12  ;;  %7611 = vmatpush3.msra.mxu0 %v2189_v12  ;;  %v2725_v32 = vsub.f32 %v2615_v28, %v9224_v8  ;;  %v3071_v47 = vpop.permute.xlu1 %3070 }
 0x24f   :  { %7613 = vmatmul.mubr.f32.vlgmr.msra.gmra.mxu0 %v2228_v0  ;;  %7620 = vmatprep.subr.mxu0 %v8035_v7  ;;  %v3074_v59 = vsel %vm1691_vm3, %v3071_v47, 0 }
 0x250   :  { %v2267_v57 = vand.u32 4294901760, %v2266_v22  ;;  %7621 = vmatpush3.msra.mxu0 %v2266_v22  ;;  %7622 = vmatprep.mubr.msk.f32.mxu0 %vm8038_vm1, %v8035_v7  ;;  %v3069_v36 = vpop.permute.xlu0 %3068  ;;  %v2726_v19 = vand.u32 4294901760, %v2725_v32  ;;  %v9251_v54 = vand.u32 4294901760, %v3074_v59 }
 0x251   :  { %7630 = vmatprep.subr.mxu0 %v8035_v7  ;;  %v3072_v38 = vsel %vm1687_vm2, %v3069_v36, 0 }
 0x252   :  { %v2268_v53 = vsub.f32 %v2266_v22, %v2267_v57  ;;  %v9238_v25 = vand.u32 4294901760, %v3072_v38  ;;  %v2727_v16 = vsub.f32 %v2725_v32, %v2726_v19  ;;  %v3184_v52 = vsub.f32 %v3074_v59, %v9251_v54 }
 0x253   :  { %7623 = vmatmul.mubr.f32.vlgmr.msra.gmra.mxu0 %v2225_v49 }
 0x254   :  { %v2269_v61 = vand.u32 4294901760, %v2268_v53  ;;  %7631 = vmatpush3.msra.mxu0 %v2267_v57  ;;  %7632 = vmatprep.mubr.msk.f32.mxu0 %vm8038_vm1, %v8035_v7  ;;  %v9246_v5 = vsub.f32 %v3072_v38, %v9238_v25  ;;  %v2728_v37 = vand.u32 4294901760, %v2727_v16  ;;  %v3185_v15 = vand.u32 4294901760, %v3184_v52 }
 0x255   :  { %7640 = vmatprep.subr.mxu0 %v8035_v7 }
 0x256   :  { %7616 = vmatpush3.msra.mxu1 %v2269_v61  ;;  %v3144_v55 = vand.u32 4294901760, %v9246_v5  ;;  %v3186_v48 = vsub.f32 %v3184_v52, %v3185_v15 }
 0x257   :  { %7618 = vmatmul.mubr.f32.vlgmr.msra.gmra.mxu1 %v9213_v13  ;;  %7625 = vmatprep.subr.mxu1 %v8035_v7 }
 0x258   :  { %7633 = vmatmul.mubr.f32.vlgmr.msra.gmra.mxu0 %v9213_v13  ;;  %7626 = vmatpush3.msra.mxu1 %v2189_v12  ;;  %v3145_v39 = vsub.f32 %v9246_v5, %v3144_v55  ;;  %v3187_v51 = vand.u32 4294901760, %v3186_v48 }
 0x259   :  { %7641 = vmatpush3.msra.mxu0 %v9224_v8  ;;  %7627 = vmatprep.mubr.msk.f32.mxu1 %vm8038_vm1, %v8035_v7 }
 0x25a   :  { %7635 = vmatprep.subr.mxu1 %v8035_v7  ;;  %7642 = vmatprep.mubr.msk.f32.mxu0 %vm8038_vm1, %v8035_v7  ;;  %v3146_v10 = vand.u32 4294901760, %v3145_v39 }
 0x25b   :  { %7650 = vmatprep.subr.mxu0 %v8035_v7  ;;  %7628 = vmatmul.mubr.f32.vlgmr.msra.gmra.mxu1 %v2226_v26 }
 0x25c   :  { %7636 = vmatpush3.msra.mxu1 %v2189_v12  ;;  %7643 = vmatmul.mubr.f32.vlgmr.msra.gmra.mxu0 %v2687_v3 }
 0x25d   :  { %7651 = vmatpush3.msra.mxu0 %v2725_v32  ;;  %7637 = vmatprep.mubr.msk.f32.mxu1 %vm8038_vm1, %v8035_v7 }
 0x25e   :  { %7645 = vmatprep.subr.mxu1 %v8035_v7  ;;  %7652 = vmatprep.mubr.msk.f32.mxu0 %vm8038_vm1, %v8035_v7 }
 0x25f   :  { %7660 = vmatprep.subr.mxu0 %v8035_v7  ;;  %7638 = vmatmul.mubr.f32.vlgmr.msra.gmra.mxu1 %v9213_v13 }
 0x260   :  { %7646 = vmatpush3.msra.mxu1 %v2728_v37  ;;  %7653 = vmatmul.mubr.f32.vlgmr.msra.gmra.mxu0 %v9222_v11 }
 0x261   :  { %7661 = vmatpush3.msra.mxu0 %v2726_v19  ;;  %7647 = vmatprep.mubr.msk.f32.mxu1 %vm8038_vm1, %v8035_v7 }
 0x262   :  { %7655 = vmatprep.subr.mxu1 %v8035_v7  ;;  %7662 = vmatprep.mubr.msk.f32.mxu0 %vm8038_vm1, %v8035_v7 }
 0x263   :  { %7670 = vmatprep.subr.mxu0 %v8035_v7  ;;  %7648 = vmatmul.mubr.f32.vlgmr.msra.gmra.mxu1 %v9217_v21 }
 0x264   :  { %7656 = vmatpush3.msra.mxu1 %v9224_v8  ;;  %7663 = vmatmul.mubr.f32.vlgmr.msra.gmra.mxu0 %v9217_v21 }
 0x265   :  { %7671 = vmatpush3.msra.mxu0 %v9251_v54  ;;  %7657 = vmatprep.mubr.msk.f32.mxu1 %vm8038_vm1, %v8035_v7 }
 0x266   :  { %7665 = vmatprep.subr.mxu1 %v8035_v7  ;;  %7672 = vmatprep.mubr.msk.f32.mxu0 %vm8038_vm1, %v8035_v7 }
 0x267   :  { %7680 = vmatprep.subr.mxu0 %v8035_v7  ;;  %7658 = vmatmul.mubr.f32.vlgmr.msra.gmra.mxu1 %v2685_v60 }
 0x268   :  { %7666 = vmatpush3.msra.mxu1 %v9224_v8  ;;  %7673 = vmatmul.mubr.f32.vlgmr.msra.gmra.mxu0 %v3146_v10 }
 0x269   :  { %7681 = vmatpush3.msra.mxu0 %v3184_v52  ;;  %7667 = vmatprep.mubr.msk.f32.mxu1 %vm8038_vm1, %v8035_v7 }
 0x26a   :  { %7675 = vmatprep.subr.mxu1 %v8035_v7  ;;  %7682 = vmatprep.mubr.msk.f32.mxu0 %vm8038_vm1, %v8035_v7 }
 0x26b   :  { %7690 = vmatprep.subr.mxu0 %v8035_v7  ;;  %7668 = vmatmul.mubr.f32.vlgmr.msra.gmra.mxu1 %v9217_v21 }
 0x26c   :  { %7676 = vmatpush3.msra.mxu1 %v3187_v51  ;;  %7683 = vmatmul.mubr.f32.vlgmr.msra.gmra.mxu0 %v9246_v5 }
 0x26d   :  { %7691 = vmatpush3.msra.mxu0 %v3185_v15  ;;  %7677 = vmatprep.mubr.msk.f32.mxu1 %vm8038_vm1, %v8035_v7 }
 0x26e   :  { %7685 = vmatprep.subr.mxu1 %v8035_v7  ;;  %7692 = vmatprep.mubr.msk.f32.mxu0 %vm8038_vm1, %v8035_v7 }
 0x26f   :  { %7700 = vmatprep.subr.mxu0 %v8035_v7  ;;  %7678 = vmatmul.mubr.f32.vlgmr.msra.gmra.mxu1 %v9238_v25 }
 0x270   :  { %7686 = vmatpush3.msra.mxu1 %v9251_v54  ;;  %7693 = vmatmul.mubr.f32.vlgmr.msra.gmra.mxu0 %v9238_v25 }
 0x271   :  { %7701 = vmatpush3.msra.mxu0 %v9288_v44  ;;  %7687 = vmatprep.mubr.msk.f32.mxu1 %vm8038_vm1, %v8035_v7 }
 0x272   :  { %7695 = vmatprep.subr.mxu1 %v8035_v7  ;;  %7702 = vmatprep.mubr.msk.f32.mxu0 %vm8038_vm1, %v8035_v7 }
 0x273   :  { %7688 = vmatmul.mubr.f32.vlgmr.msra.gmra.mxu1 %v3144_v55  ;;  %7710 = vmatprep.subr.mxu0 %v8035_v7 }
 0x274   :  { %7696 = vmatpush3.msra.mxu1 %v9251_v54  ;;  %7697 = vmatprep.mubr.msk.f32.mxu1 %vm8038_vm1, %v8035_v7 }
 0x275   :  { %7705 = vmatprep.subr.mxu1 %v8035_v7 }
 0x277   :  { %7698 = vmatmul.mubr.f32.vlgmr.msra.gmra.mxu1 %v9238_v25 }
 0x278   :  { %7706 = vmatpush3.msra.mxu1 %v3647_v34  ;;  %7707 = vmatprep.mubr.msk.f32.mxu1 %vm8038_vm1, %v8035_v7 }
 0x279   :  { %7715 = vmatprep.subr.mxu1 %v8035_v7 }
 0x29c   :  { %v1767_v14 = vpop.f32.mrf.mxu0 }
 0x29e   :  { %v7584_v4 = vpop.f32.mrf.mxu0 }
 0x2a0   :  { %v1917_v17 = vpop.f32.mrf.mxu0 }
 0x2a2   :  { %v7594_v27 = vpop.f32.mrf.mxu0 }
 0x2a4   :  { %v1843_v30 = vpop.f32.mrf.mxu1 }
 0x2a5   :  { %v1844_v45 = vadd.f32 %v1843_v30, %v1767_v14 }
 0x2a6   :  { %v7589_v58 = vpop.f32.mrf.mxu1  ;;  %v2065_v1 = vpop.f32.mrf.mxu0 }
 0x2a7   :  { %v1918_v43 = vadd.f32 %v1917_v17, %v1844_v45 }
 0x2a8   :  { %v1991_v2 = vpop.f32.mrf.mxu1  ;;  %v7604_v23 = vpop.f32.mrf.mxu0 }
 0x2a9   :  { %v1992_v18 = vadd.f32 %v1991_v2, %v1918_v43  ;;  %v2141_v23 = vlaneseq }
 0x2aa   :  { %v7599_v42 = vpop.f32.mrf.mxu1 }
 0x2ab   :  { %v2066_v63 = vadd.f32 %v2065_v1, %v1992_v18  ;;  %v2142_v18 = vshrl.u32 %v2141_v23, 7 }
 0x2ac   :  { %v2137_v50 = vpop.f32.mrf.mxu1 }
 0x2ad   :  { %v2138_v13 = vadd.f32 %v2137_v50, %v2066_v63  ;;  %v2143_v42 = vsub.s32 4, %v2142_v18 }
 0x2ae   :  { %v7609_v49 = vpop.f32.mrf.mxu1 }
 0x2af   :  { %2146 = vrot.lane.b32.xlu0 %v2138_v13, %s8039_s10  ;;  %v9338_v50 = vrot.slane %v9180_v24, %v2143_v42 }
 0x30f   :  { %v2230_v26 = vpop.f32.mrf.mxu0 }
 0x311   :  { %v7614_v31 = vpop.f32.mrf.mxu0 }
 0x313   :  { %v2380_v62 = vpop.f32.mrf.mxu0 }
 0x315   :  { %v7624_v35 = vpop.f32.mrf.mxu0 }
 0x317   :  { %v2306_v21 = vpop.f32.mrf.mxu1 }
 0x318   :  { %v2307_v56 = vadd.f32 %v2306_v21, %v2230_v26  ;;  %v2528_v46 = vpop.f32.mrf.mxu0 }
 0x319   :  { %v7619_v0 = vpop.f32.mrf.mxu1 }
 0x31a   :  { %v7634_v28 = vpop.f32.mrf.mxu0  ;;  %v2381_v41 = vadd.f32 %v2380_v62, %v2307_v56 }
 0x31b   :  { %v2454_v11 = vpop.f32.mrf.mxu1 }
 0x31c   :  { %v2455_v12 = vadd.f32 %v2454_v11, %v2381_v41  ;;  %v2689_v8 = vpop.f32.mrf.mxu0 }
 0x31d   :  { %v7629_v22 = vpop.f32.mrf.mxu1 }
 0x31e   :  { %v7644_v60 = vpop.f32.mrf.mxu0  ;;  %v2529_v57 = vadd.f32 %v2528_v46, %v2455_v12 }
 0x31f   :  { %v2600_v36 = vpop.f32.mrf.mxu1 }
 0x320   :  { %v2601_v38 = vadd.f32 %v2600_v36, %v2529_v57  ;;  %v2839_v32 = vpop.f32.mrf.mxu0 }
 0x321   :  { %v7639_v53 = vpop.f32.mrf.mxu1  ;;  %v2147_v63 = vpop.permute.xlu0 %2146 }
 0x322   :  { %v7654_v20 = vpop.f32.mrf.mxu0  ;;  %2605 = vrot.lane.b32.xlu1 %v2601_v38, %s8039_s10  ;;  %v2149_v49 = vadd.f32 %v2147_v63, %v9338_v50 }
 0x323   :  { %v2765_v61 = vpop.f32.mrf.mxu1 }
 0x324   :  { %v2766_v47 = vadd.f32 %v2765_v61, %v2689_v8  ;;  %v2987_v25 = vpop.f32.mrf.mxu0 }
 0x325   :  { %v7649_v19 = vpop.f32.mrf.mxu1 }
 0x326   :  { %v7664_v59 = vpop.f32.mrf.mxu0  ;;  %v2840_v3 = vadd.f32 %v2839_v32, %v2766_v47 }
 0x327   :  { %v2913_v5 = vpop.f32.mrf.mxu1 }
 0x328   :  { %v2914_v16 = vadd.f32 %v2913_v5, %v2840_v3  ;;  %v3148_v54 = vpop.f32.mrf.mxu0 }
 0x329   :  { %v7659_v55 = vpop.f32.mrf.mxu1 }
 0x32a   :  { %v7674_v37 = vpop.f32.mrf.mxu0  ;;  %v2988_v52 = vadd.f32 %v2987_v25, %v2914_v16 }
 0x32b   :  { %v3059_v39 = vpop.f32.mrf.mxu1 }
 0x32c   :  { %v3060_v15 = vadd.f32 %v3059_v39, %v2988_v52  ;;  %v3298_v9 = vpop.f32.mrf.mxu0 }
 0x32d   :  { %v7669_v10 = vpop.f32.mrf.mxu1 }
 0x32e   :  { %v7684_v48 = vpop.f32.mrf.mxu0  ;;  %3064 = vrot.lane.b32.xlu0 %v3060_v15, %s8039_s10 }
 0x32f   :  { %v3224_v51 = vpop.f32.mrf.mxu1 }
 0x330   :  { %v3225_v6 = vadd.f32 %v3224_v51, %v3148_v54  ;;  %v3446_v34 = vpop.f32.mrf.mxu0 }
 0x331   :  { %v7679_v14 = vpop.f32.mrf.mxu1 }
 0x332   :  { %v7694_v4 = vpop.f32.mrf.mxu0  ;;  %v3299_v17 = vadd.f32 %v3298_v9, %v3225_v6 }
 0x333   :  { %v3372_v27 = vpop.f32.mrf.mxu1 }
 0x334   :  { %v3373_v30 = vadd.f32 %v3372_v27, %v3299_v17 }
 0x335   :  { %v7689_v45 = vpop.f32.mrf.mxu1 }
 0x336   :  { %v3447_v58 = vadd.f32 %v3446_v34, %v3373_v30 }
 0x337   :  { %v3518_v1 = vpop.f32.mrf.mxu1 }
 0x338   :  { %v3519_v43 = vadd.f32 %v3518_v1, %v3447_v58 }
 0x339   :  { %v7699_v2 = vpop.f32.mrf.mxu1 }
 0x33a   :  { %3523 = vrot.lane.b32.xlu1 %v3519_v43, %s8039_s10 }
 0x394   :  { %v2606_v13 = vpop.permute.xlu1 %2605 }
 0x395   :  { %v2608_v31 = vadd.f32 %v2606_v13, %v2149_v49 }
 0x3a0   :  { %v3065_v26 = vpop.permute.xlu0 %3064 }
 0x3a1   :  { %v3067_v62 = vadd.f32 %v3065_v26, %v2608_v31 }
 0x3ac   :  { %v3524_v35 = vpop.permute.xlu1 %3523 }
 0x3ad   :  { %v3526_v21 = vadd.f32 %v3524_v35, %v3067_v62 }
 0x3af   :  { %v3527_v56 = vmax.f32 %v3526_v21, 0.0 }
 0x3b1   :  { %3987 = vrot.lane.b32.xlu1 %v3527_v56, %s8043_s13  ;;  %3529 = vrot.lane.b32.xlu0 %v3527_v56, %s8039_s10 }
 0x3b5   :  { %4446 = vrot.lane.b32.xlu1 %v3527_v56, %s8044_s14  ;;  %3989 = vrot.lane.b32.xlu0 %v9265_v29, %s8037_s7 }
 0x3b9   :  { %4905 = vrot.lane.b32.xlu1 %v3527_v56, %s8045_s15  ;;  %4448 = vrot.lane.b32.xlu0 %v9265_v29, %s8046_s16 }
 0x3bd   :  { %5364 = vrot.lane.b32.xlu1 %v3527_v56, %s8047_s17  ;;  %4907 = vrot.lane.b32.xlu0 %v9265_v29, %s8048_s18 }
 0x3c1   :  { %5823 = vrot.lane.b32.xlu1 %v3527_v56, %s8049_s19  ;;  %5366 = vrot.lane.b32.xlu0 %v9265_v29, %s8040_s11 }
 0x3c5   :  { %6282 = vrot.lane.b32.xlu1 %v3527_v56, %s8050_s20  ;;  %5825 = vrot.lane.b32.xlu0 %v9265_v29, %s8051_s21 }
 0x3c9   :  { %6741 = vrot.lane.b32.xlu1 %v3527_v56, %s8052_s22  ;;  %6284 = vrot.lane.b32.xlu0 %v9265_v29, %s8053_s23 }
 0x3cd   :  { %6743 = vrot.lane.b32.xlu0 %v9265_v29, %s8054_s24 }
 0x423   :  { %v3988_v24 = vpop.permute.xlu1 %3987  ;;  %v3530_v46 = vpop.permute.xlu0 %3529 }
 0x424   :  { %v3532_v0 = vsel %vm1687_vm2, %v3530_v46, 0  ;;  %v3991_v41 = vsel %vm1687_vm2, %v3988_v24, 0 }
 0x425   :  { %v3602_v28 = vand.u32 4294901760, %v3532_v0  ;;  %v9357_v22 = vand.u32 4294901760, %v3991_v41 }
 0x427   :  { %v3603_v11 = vsub.f32 %v3532_v0, %v3602_v28  ;;  %7708 = vmatmul.mubr.f32.vlgmr.msra.gmra.mxu1 %v3602_v28  ;;  %v3990_v12 = vpop.permute.xlu0 %3989  ;;  %v4062_v53 = vsub.f32 %v3991_v41, %v9357_v22  ;;  %v4447_v25 = vpop.permute.xlu1 %4446 }
 0x428   :  { %7716 = vmatpush3.msra.mxu1 %v9288_v44  ;;  %v3993_v8 = vsel %vm1691_vm3, %v3990_v12, 0  ;;  %7717 = vmatprep.mubr.msk.f32.mxu1 %vm8038_vm1, %v8035_v7  ;;  %v4450_v5 = vsel %vm1687_vm2, %v4447_v25, 0 }
 0x429   :  { %v3604_v29 = vand.u32 4294901760, %v3603_v11  ;;  %v4026_v60 = vand.u32 4294901760, %v3993_v8  ;;  %7725 = vmatprep.subr.mxu1 %v8035_v7  ;;  %v4063_v59 = vand.u32 4294901760, %v4062_v53  ;;  %v9386_v37 = vand.u32 4294901760, %v4450_v5 }
 0x42b   :  { %v3605_v57 = vsub.f32 %v3603_v11, %v3604_v29  ;;  %v9360_v36 = vsub.f32 %v3993_v8, %v4026_v60  ;;  %7718 = vmatmul.mubr.f32.vlgmr.msra.gmra.mxu1 %v3604_v29  ;;  %v4449_v38 = vpop.permute.xlu0 %4448  ;;  %v4064_v55 = vsub.f32 %v4062_v53, %v4063_v59  ;;  %v4521_v15 = vsub.f32 %v4450_v5, %v9386_v37  ;;  %v4906_v9 = vpop.permute.xlu1 %4905 }
 0x42c   :  { %7726 = vmatpush3.msra.mxu1 %v9288_v44  ;;  %v4452_v32 = vsel %vm1691_vm3, %v4449_v38, 0  ;;  %7727 = vmatprep.mubr.msk.f32.mxu1 %vm8038_vm1, %v8035_v7  ;;  %v4909_v6 = vsel %vm1687_vm2, %v4906_v9, 0 }
 0x42d   :  { %v3606_v20 = vand.u32 4294901760, %v3605_v57  ;;  %v4104_v61 = vand.u32 4294901760, %v9360_v36  ;;  %7735 = vmatprep.subr.mxu1 %v8035_v7  ;;  %v9369_v47 = vand.u32 4294901760, %v4452_v32  ;;  %v4065_v39 = vand.u32 4294901760, %v4064_v55 }
 0x42e   :  { %v4522_v51 = vand.u32 4294901760, %v4521_v15  ;;  %v9420_v17 = vand.u32 4294901760, %v4909_v6 }
 0x42f   :  { %v4105_v19 = vsub.f32 %v9360_v36, %v4104_v61  ;;  %7703 = vmatmul.mubr.f32.vlgmr.msra.gmra.mxu0 %v3606_v20  ;;  %7728 = vmatmul.mubr.f32.vlgmr.msra.gmra.mxu1 %v3602_v28  ;;  %v9373_v44 = vsub.f32 %v4452_v32, %v9369_v47  ;;  %v4908_v16 = vpop.permute.xlu0 %4907  ;;  %v5365_v43 = vpop.permute.xlu1 %5364 }
 0x430   :  { %7711 = vmatpush3.msra.mxu0 %v9300_v40  ;;  %7712 = vmatprep.mubr.msk.f32.mxu0 %vm8038_vm1, %v8035_v7  ;;  %v4911_v52 = vsel %vm1691_vm3, %v4908_v16, 0  ;;  %v4523_v4 = vsub.f32 %v4521_v15, %v4522_v51  ;;  %v4980_v1 = vsub.f32 %v4909_v6, %v9420_v17  ;;  %v5368_v42 = vsel %vm1687_vm2, %v5365_v43, 0 }
 0x431   :  { %v4106_v3 = vand.u32 4294901760, %v4105_v19  ;;  %7720 = vmatprep.subr.mxu0 %v8035_v7  ;;  %7737 = vmatprep.mubr.msk.f32.mxu1 %vm8038_vm1, %v8035_v7  ;;  %v4563_v54 = vand.u32 4294901760, %v9373_v44  ;;  %v9461_v26 = vand.u32 4294901760, %v5368_v42 }
 0x432   :  { %v4524_v58 = vand.u32 4294901760, %v4523_v4  ;;  %v4981_v18 = vand.u32 4294901760, %v4980_v1 }
 0x433   :  { %7713 = vmatmul.mubr.f32.vlgmr.msra.gmra.mxu0 %v3603_v11  ;;  %7736 = vmatpush3.msra.mxu1 %v4106_v3  ;;  %v4564_v40 = vsub.f32 %v9373_v44, %v4563_v54  ;;  %v5367_v34 = vpop.permute.xlu0 %5366  ;;  %v5439_v56 = vsub.f32 %v5368_v42, %v9461_v26  ;;  %v5824_v24 = vpop.permute.xlu1 %5823 }
 0x434   :  { %7721 = vmatpush3.msra.mxu0 %v3645_v33  ;;  %7738 = vmatmul.mubr.f32.vlgmr.msra.gmra.mxu1 %v9357_v22  ;;  %v9396_v33 = vand.u32 4294901760, %v4911_v52  ;;  %v5370_v27 = vsel %vm1691_vm3, %v5367_v34, 0  ;;  %v4982_v49 = vsub.f32 %v4980_v1, %v4981_v18  ;;  %v5827_v41 = vsel %vm1687_vm2, %v5824_v24, 0 }
 0x435   :  { %7745 = vmatprep.subr.mxu1 %v8035_v7  ;;  %7722 = vmatprep.mubr.msk.f32.mxu0 %vm8038_vm1, %v8035_v7  ;;  %v4565_v10 = vand.u32 4294901760, %v4564_v40  ;;  %v9433_v45 = vand.u32 4294901760, %v5370_v27 }
 0x436   :  { %7746 = vmatpush3.msra.mxu1 %v4026_v60  ;;  %7730 = vmatprep.subr.mxu0 %v8035_v7  ;;  %v9406_v48 = vsub.f32 %v4911_v52, %v9396_v33  ;;  %v4983_v21 = vand.u32 4294901760, %v4982_v49 }
 0x437   :  { %7723 = vmatmul.mubr.f32.vlgmr.msra.gmra.mxu0 %v3602_v28  ;;  %7747 = vmatprep.mubr.msk.f32.mxu1 %vm8038_vm1, %v8035_v7  ;;  %v9445_v23 = vsub.f32 %v5370_v27, %v9433_v45  ;;  %v5826_v63 = vpop.permute.xlu0 %5825  ;;  %v5440_v28 = vand.u32 4294901760, %v5439_v56  ;;  %v6283_v32 = vpop.permute.xlu1 %6282 }
 0x438   :  { %7731 = vmatpush3.msra.mxu0 %v4026_v60  ;;  %7755 = vmatprep.subr.mxu1 %v8035_v7  ;;  %v5022_v14 = vand.u32 4294901760, %v9406_v48  ;;  %v5829_v31 = vsel %vm1691_vm3, %v5826_v63, 0 }
 0x439   :  { %7748 = vmatmul.mubr.f32.vlgmr.msra.gmra.mxu1 %v4063_v59  ;;  %7732 = vmatprep.mubr.msk.f32.mxu0 %vm8038_vm1, %v8035_v7  ;;  %v5481_v13 = vand.u32 4294901760, %v9445_v23  ;;  %v9474_v35 = vand.u32 4294901760, %v5829_v31  ;;  %v5441_v8 = vsub.f32 %v5439_v56, %v5440_v28 }
 0x43a   :  { %7756 = vmatpush3.msra.mxu1 %v4026_v60  ;;  %7740 = vmatprep.subr.mxu0 %v8035_v7  ;;  %v5023_v30 = vsub.f32 %v9406_v48, %v5022_v14 }
 0x43b   :  { %7733 = vmatmul.mubr.f32.vlgmr.msra.gmra.mxu0 %v4065_v39  ;;  %7757 = vmatprep.mubr.msk.f32.mxu1 %vm8038_vm1, %v8035_v7  ;;  %v5482_v62 = vsub.f32 %v9445_v23, %v5481_v13  ;;  %v9486_v0 = vsub.f32 %v5829_v31, %v9474_v35  ;;  %v6285_v11 = vpop.permute.xlu0 %6284 }
 0x43c   :  { %7741 = vmatpush3.msra.mxu0 %v9360_v36  ;;  %7765 = vmatprep.subr.mxu1 %v8035_v7  ;;  %v5024_v2 = vand.u32 4294901760, %v5023_v30  ;;  %v6288_v29 = vsel %vm1691_vm3, %v6285_v11, 0  ;;  %v5442_v36 = vand.u32 4294901760, %v5441_v8 }
 0x43d   :  { %7758 = vmatmul.mubr.f32.vlgmr.msra.gmra.mxu1 %v9357_v22  ;;  %7742 = vmatprep.mubr.msk.f32.mxu0 %vm8038_vm1, %v8035_v7  ;;  %v5483_v46 = vand.u32 4294901760, %v5482_v62  ;;  %v5940_v12 = vand.u32 4294901760, %v9486_v0  ;;  %v9515_v57 = vand.u32 4294901760, %v6288_v29 }
 0x43e   :  { %7766 = vmatpush3.msra.mxu1 %v4565_v10  ;;  %7750 = vmatprep.subr.mxu0 %v8035_v7 }
 0x43f   :  { %7743 = vmatmul.mubr.f32.vlgmr.msra.gmra.mxu0 %v4062_v53  ;;  %7767 = vmatprep.mubr.msk.f32.mxu1 %vm8038_vm1, %v8035_v7  ;;  %v5941_v60 = vsub.f32 %v9486_v0, %v5940_v12  ;;  %v9527_v20 = vsub.f32 %v6288_v29, %v9515_v57  ;;  %v6744_v25 = vpop.permute.xlu0 %6743 }
 0x440   :  { %7751 = vmatpush3.msra.mxu0 %v4104_v61  ;;  %7775 = vmatprep.subr.mxu1 %v8035_v7  ;;  %v6747_v3 = vsel %vm1691_vm3, %v6744_v25, 0 }
 0x441   :  { %7768 = vmatmul.mubr.f32.vlgmr.msra.gmra.mxu1 %v9386_v37  ;;  %7752 = vmatprep.mubr.msk.f32.mxu0 %vm8038_vm1, %v8035_v7  ;;  %v5942_v53 = vand.u32 4294901760, %v5941_v60  ;;  %v6399_v19 = vand.u32 4294901760, %v9527_v20  ;;  %v9556_v16 = vand.u32 4294901760, %v6747_v3 }
 0x442   :  { %7776 = vmatpush3.msra.mxu1 %v9369_v47  ;;  %7760 = vmatprep.subr.mxu0 %v8035_v7 }
 0x443   :  { %7753 = vmatmul.mubr.f32.vlgmr.msra.gmra.mxu0 %v9357_v22  ;;  %7777 = vmatprep.mubr.msk.f32.mxu1 %vm8038_vm1, %v8035_v7  ;;  %v9502_v22 = vand.u32 4294901760, %v5827_v41  ;;  %v6400_v5 = vsub.f32 %v9527_v20, %v6399_v19  ;;  %v9568_v40 = vsub.f32 %v6747_v3, %v9556_v16 }
 0x444   :  { %7761 = vmatpush3.msra.mxu0 %v9369_v47  ;;  %7785 = vmatprep.subr.mxu1 %v8035_v7 }
 0x445   :  { %7778 = vmatmul.mubr.f32.vlgmr.msra.gmra.mxu1 %v4522_v51  ;;  %7762 = vmatprep.mubr.msk.f32.mxu0 %vm8038_vm1, %v8035_v7  ;;  %v5898_v38 = vsub.f32 %v5827_v41, %v9502_v22  ;;  %v6401_v52 = vand.u32 4294901760, %v6400_v5 }
 0x446   :  { %7786 = vmatpush3.msra.mxu1 %v9369_v47  ;;  %7770 = vmatprep.subr.mxu0 %v8035_v7  ;;  %v6286_v47 = vsel %vm1687_vm2, %v6283_v32, 0 }
 0x447   :  { %7763 = vmatmul.mubr.f32.vlgmr.msra.gmra.mxu0 %v4524_v58  ;;  %7787 = vmatprep.mubr.msk.f32.mxu1 %vm8038_vm1, %v8035_v7  ;;  %v5899_v61 = vand.u32 4294901760, %v5898_v38  ;;  %v9543_v59 = vand.u32 4294901760, %v6286_v47 }
 0x448   :  { %7771 = vmatpush3.msra.mxu0 %v9373_v44  ;;  %7795 = vmatprep.subr.mxu1 %v8035_v7 }
 0x449   :  { %7788 = vmatmul.mubr.f32.vlgmr.msra.gmra.mxu1 %v9386_v37  ;;  %7772 = vmatprep.mubr.msk.f32.mxu0 %vm8038_vm1, %v8035_v7  ;;  %v5900_v44 = vsub.f32 %v5898_v38, %v5899_v61  ;;  %v6357_v55 = vsub.f32 %v6286_v47, %v9543_v59 }
 0x44a   :  { %7796 = vmatpush3.msra.mxu1 %v5024_v2  ;;  %7780 = vmatprep.subr.mxu0 %v8035_v7 }
 0x44b   :  { %7773 = vmatmul.mubr.f32.vlgmr.msra.gmra.mxu0 %v4521_v15  ;;  %7797 = vmatprep.mubr.msk.f32.mxu1 %vm8038_vm1, %v8035_v7  ;;  %v6858_v15 = vand.u32 4294901760, %v9568_v40 }
 0x44c   :  { %7781 = vmatpush3.msra.mxu0 %v4563_v54  ;;  %7805 = vmatprep.subr.mxu1 %v8035_v7  ;;  %v5901_v54 = vand.u32 4294901760, %v5900_v44 }
 0x44d   :  { %7798 = vmatmul.mubr.f32.vlgmr.msra.gmra.mxu1 %v9420_v17  ;;  %7782 = vmatprep.mubr.msk.f32.mxu0 %vm8038_vm1, %v8035_v7 }
 0x44e   :  { %7806 = vmatpush3.msra.mxu1 %v9396_v33  ;;  %7790 = vmatprep.subr.mxu0 %v8035_v7 }
 0x44f   :  { %7783 = vmatmul.mubr.f32.vlgmr.msra.gmra.mxu0 %v9386_v37  ;;  %7807 = vmatprep.mubr.msk.f32.mxu1 %vm8038_vm1, %v8035_v7  ;;  %v6742_v37 = vpop.permute.xlu1 %6741 }
 0x450   :  { %7791 = vmatpush3.msra.mxu0 %v9396_v33  ;;  %7815 = vmatprep.subr.mxu1 %v8035_v7  ;;  %v6745_v39 = vsel %vm1687_vm2, %v6742_v37, 0 }
 0x451   :  { %7808 = vmatmul.mubr.f32.vlgmr.msra.gmra.mxu1 %v4981_v18  ;;  %7792 = vmatprep.mubr.msk.f32.mxu0 %vm8038_vm1, %v8035_v7  ;;  %v6815_v10 = vand.u32 4294901760, %v6745_v39 }
 0x452   :  { %7816 = vmatpush3.msra.mxu1 %v9396_v33  ;;  %7800 = vmatprep.subr.mxu0 %v8035_v7  ;;  %v6358_v33 = vand.u32 4294901760, %v6357_v55 }
 0x453   :  { %7793 = vmatmul.mubr.f32.vlgmr.msra.gmra.mxu0 %v4983_v21  ;;  %7817 = vmatprep.mubr.msk.f32.mxu1 %vm8038_vm1, %v8035_v7  ;;  %v6816_v6 = vsub.f32 %v6745_v39, %v6815_v10 }
 0x454   :  { %7801 = vmatpush3.msra.mxu0 %v9406_v48  ;;  %7825 = vmatprep.subr.mxu1 %v8035_v7  ;;  %v6359_v9 = vsub.f32 %v6357_v55, %v6358_v33  ;;  %v6859_v48 = vsub.f32 %v9568_v40, %v6858_v15 }
 0x455   :  { %7818 = vmatmul.mubr.f32.vlgmr.msra.gmra.mxu1 %v9420_v17  ;;  %7802 = vmatprep.mubr.msk.f32.mxu0 %vm8038_vm1, %v8035_v7 }
 0x456   :  { %7826 = vmatpush3.msra.mxu1 %v5483_v46  ;;  %7810 = vmatprep.subr.mxu0 %v8035_v7  ;;  %v6360_v51 = vand.u32 4294901760, %v6359_v9  ;;  %v6860_v34 = vand.u32 4294901760, %v6859_v48 }
 0x457   :  { %7803 = vmatmul.mubr.f32.vlgmr.msra.gmra.mxu0 %v4980_v1  ;;  %7827 = vmatprep.mubr.msk.f32.mxu1 %vm8038_vm1, %v8035_v7 }
 0x458   :  { %7811 = vmatpush3.msra.mxu0 %v5022_v14  ;;  %7835 = vmatprep.subr.mxu1 %v8035_v7  ;;  %v6817_v14 = vand.u32 4294901760, %v6816_v6 }
 0x459   :  { %7828 = vmatmul.mubr.f32.vlgmr.msra.gmra.mxu1 %v9461_v26  ;;  %7812 = vmatprep.mubr.msk.f32.mxu0 %vm8038_vm1, %v8035_v7 }
 0x45a   :  { %7836 = vmatpush3.msra.mxu1 %v9433_v45  ;;  %7820 = vmatprep.subr.mxu0 %v8035_v7  ;;  %v6818_v4 = vsub.f32 %v6816_v6, %v6817_v14 }
 0x45b   :  { %7813 = vmatmul.mubr.f32.vlgmr.msra.gmra.mxu0 %v9420_v17  ;;  %7837 = vmatprep.mubr.msk.f32.mxu1 %vm8038_vm1, %v8035_v7 }
 0x45c   :  { %7821 = vmatpush3.msra.mxu0 %v9433_v45  ;;  %7845 = vmatprep.subr.mxu1 %v8035_v7  ;;  %v6819_v17 = vand.u32 4294901760, %v6818_v4 }
 0x45d   :  { %7838 = vmatmul.mubr.f32.vlgmr.msra.gmra.mxu1 %v5440_v28  ;;  %7822 = vmatprep.mubr.msk.f32.mxu0 %vm8038_vm1, %v8035_v7 }
 0x45e   :  { %7846 = vmatpush3.msra.mxu1 %v9433_v45  ;;  %7830 = vmatprep.subr.mxu0 %v8035_v7 }
 0x45f   :  { %7823 = vmatmul.mubr.f32.vlgmr.msra.gmra.mxu0 %v5442_v36  ;;  %7847 = vmatprep.mubr.msk.f32.mxu1 %vm8038_vm1, %v8035_v7 }
 0x460   :  { %7831 = vmatpush3.msra.mxu0 %v9445_v23  ;;  %7855 = vmatprep.subr.mxu1 %v8035_v7 }
 0x461   :  { %7848 = vmatmul.mubr.f32.vlgmr.msra.gmra.mxu1 %v9461_v26  ;;  %7832 = vmatprep.mubr.msk.f32.mxu0 %vm8038_vm1, %v8035_v7 }
 0x462   :  { %7856 = vmatpush3.msra.mxu1 %v5942_v53  ;;  %7840 = vmatprep.subr.mxu0 %v8035_v7 }
 0x463   :  { %7833 = vmatmul.mubr.f32.vlgmr.msra.gmra.mxu0 %v5439_v56  ;;  %7857 = vmatprep.mubr.msk.f32.mxu1 %vm8038_vm1, %v8035_v7 }
 0x464   :  { %7841 = vmatpush3.msra.mxu0 %v5481_v13  ;;  %7865 = vmatprep.subr.mxu1 %v8035_v7 }
 0x465   :  { %7858 = vmatmul.mubr.f32.vlgmr.msra.gmra.mxu1 %v9502_v22  ;;  %7842 = vmatprep.mubr.msk.f32.mxu0 %vm8038_vm1, %v8035_v7 }
 0x466   :  { %7866 = vmatpush3.msra.mxu1 %v9474_v35  ;;  %7850 = vmatprep.subr.mxu0 %v8035_v7 }
 0x467   :  { %7843 = vmatmul.mubr.f32.vlgmr.msra.gmra.mxu0 %v9461_v26  ;;  %7867 = vmatprep.mubr.msk.f32.mxu1 %vm8038_vm1, %v8035_v7 }
 0x468   :  { %7851 = vmatpush3.msra.mxu0 %v9474_v35  ;;  %7875 = vmatprep.subr.mxu1 %v8035_v7 }
 0x469   :  { %7868 = vmatmul.mubr.f32.vlgmr.msra.gmra.mxu1 %v5899_v61  ;;  %7852 = vmatprep.mubr.msk.f32.mxu0 %vm8038_vm1, %v8035_v7 }
 0x46a   :  { %7876 = vmatpush3.msra.mxu1 %v9474_v35  ;;  %7860 = vmatprep.subr.mxu0 %v8035_v7 }
 0x46b   :  { %7853 = vmatmul.mubr.f32.vlgmr.msra.gmra.mxu0 %v5901_v54  ;;  %7877 = vmatprep.mubr.msk.f32.mxu1 %vm8038_vm1, %v8035_v7 }
 0x46c   :  { %7861 = vmatpush3.msra.mxu0 %v9486_v0  ;;  %7885 = vmatprep.subr.mxu1 %v8035_v7 }
 0x46d   :  { %7878 = vmatmul.mubr.f32.vlgmr.msra.gmra.mxu1 %v9502_v22  ;;  %7862 = vmatprep.mubr.msk.f32.mxu0 %vm8038_vm1, %v8035_v7 }
 0x46e   :  { %7886 = vmatpush3.msra.mxu1 %v6401_v52  ;;  %7870 = vmatprep.subr.mxu0 %v8035_v7 }
 0x46f   :  { %7863 = vmatmul.mubr.f32.vlgmr.msra.gmra.mxu0 %v5898_v38  ;;  %7887 = vmatprep.mubr.msk.f32.mxu1 %vm8038_vm1, %v8035_v7 }
 0x470   :  { %7871 = vmatpush3.msra.mxu0 %v5940_v12  ;;  %7895 = vmatprep.subr.mxu1 %v8035_v7 }
 0x471   :  { %7888 = vmatmul.mubr.f32.vlgmr.msra.gmra.mxu1 %v9543_v59  ;;  %7872 = vmatprep.mubr.msk.f32.mxu0 %vm8038_vm1, %v8035_v7 }
 0x472   :  { %7896 = vmatpush3.msra.mxu1 %v9515_v57  ;;  %7880 = vmatprep.subr.mxu0 %v8035_v7 }
 0x473   :  { %7873 = vmatmul.mubr.f32.vlgmr.msra.gmra.mxu0 %v9502_v22  ;;  %7897 = vmatprep.mubr.msk.f32.mxu1 %vm8038_vm1, %v8035_v7 }
 0x474   :  { %7881 = vmatpush3.msra.mxu0 %v9515_v57  ;;  %7905 = vmatprep.subr.mxu1 %v8035_v7 }
 0x475   :  { %7898 = vmatmul.mubr.f32.vlgmr.msra.gmra.mxu1 %v6358_v33  ;;  %7882 = vmatprep.mubr.msk.f32.mxu0 %vm8038_vm1, %v8035_v7 }
 0x476   :  { %7906 = vmatpush3.msra.mxu1 %v9515_v57  ;;  %7890 = vmatprep.subr.mxu0 %v8035_v7 }
 0x477   :  { %7883 = vmatmul.mubr.f32.vlgmr.msra.gmra.mxu0 %v6360_v51  ;;  %7907 = vmatprep.mubr.msk.f32.mxu1 %vm8038_vm1, %v8035_v7 }
 0x478   :  { %7891 = vmatpush3.msra.mxu0 %v9527_v20  ;;  %7915 = vmatprep.subr.mxu1 %v8035_v7 }
 0x479   :  { %7908 = vmatmul.mubr.f32.vlgmr.msra.gmra.mxu1 %v9543_v59  ;;  %7892 = vmatprep.mubr.msk.f32.mxu0 %vm8038_vm1, %v8035_v7 }
 0x47a   :  { %7916 = vmatpush3.msra.mxu1 %v6860_v34  ;;  %7900 = vmatprep.subr.mxu0 %v8035_v7 }
 0x47b   :  { %7893 = vmatmul.mubr.f32.vlgmr.msra.gmra.mxu0 %v6357_v55  ;;  %7917 = vmatprep.mubr.msk.f32.mxu1 %vm8038_vm1, %v8035_v7 }
 0x47c   :  { %7901 = vmatpush3.msra.mxu0 %v6399_v19  ;;  %7925 = vmatprep.subr.mxu1 %v8035_v7 }
 0x47d   :  { %7918 = vmatmul.mubr.f32.vlgmr.msra.gmra.mxu1 %v6815_v10  ;;  %7902 = vmatprep.mubr.msk.f32.mxu0 %vm8038_vm1, %v8035_v7 }
 0x47e   :  { %7926 = vmatpush3.msra.mxu1 %v9556_v16  ;;  %7910 = vmatprep.subr.mxu0 %v8035_v7 }
 0x47f   :  { %7903 = vmatmul.mubr.f32.vlgmr.msra.gmra.mxu0 %v9543_v59  ;;  %7927 = vmatprep.mubr.msk.f32.mxu1 %vm8038_vm1, %v8035_v7 }
 0x480   :  { %7911 = vmatpush3.msra.mxu0 %v9556_v16  ;;  %7935 = vmatprep.subr.mxu1 %v8035_v7 }
 0x481   :  { %7928 = vmatmul.mubr.f32.vlgmr.msra.gmra.mxu1 %v6817_v14  ;;  %7912 = vmatprep.mubr.msk.f32.mxu0 %vm8038_vm1, %v8035_v7 }
 0x482   :  { %7936 = vmatpush3.msra.mxu1 %v9556_v16  ;;  %7920 = vmatprep.subr.mxu0 %v8035_v7 }
 0x483   :  { %7913 = vmatmul.mubr.f32.vlgmr.msra.gmra.mxu0 %v6819_v17  ;;  %7937 = vmatprep.mubr.msk.f32.mxu1 %vm8038_vm1, %v8035_v7 }
 0x484   :  { %7921 = vmatpush3.msra.mxu0 %v9568_v40  ;;  %7922 = vmatprep.mubr.msk.f32.mxu0 %vm8038_vm1, %v8035_v7 }
 0x485   :  { %7938 = vmatmul.mubr.f32.vlgmr.msra.gmra.mxu1 %v6815_v10  ;;  %7930 = vmatprep.subr.mxu0 %v8035_v7 }
 0x487   :  { %7923 = vmatmul.mubr.f32.vlgmr.msra.gmra.mxu0 %v6816_v6 }
 0x488   :  { %7931 = vmatpush3.msra.mxu0 %v6858_v15  ;;  %7932 = vmatprep.mubr.msk.f32.mxu0 %vm8038_vm1, %v8035_v7 }
 0x48b   :  { %7933 = vmatmul.mubr.f32.vlgmr.msra.gmra.mxu0 %v6815_v10 }
 0x4e7   :  { %v3684_v27 = vpop.f32.mrf.mxu1 }
 0x4e9   :  { %v7709_v30 = vpop.f32.mrf.mxu1 }
 0x4eb   :  { %v3832_v45 = vpop.f32.mrf.mxu1 }
 0x4ed   :  { %v7719_v58 = vpop.f32.mrf.mxu1 }
 0x4ef   :  { %v3608_v1 = vpop.f32.mrf.mxu0  ;;  %v3978_v43 = vpop.f32.mrf.mxu1 }
 0x4f0   :  { %v3685_v18 = vadd.f32 %v3684_v27, %v3608_v1 }
 0x4f1   :  { %v7704_v2 = vpop.f32.mrf.mxu0  ;;  %v7729_v23 = vpop.f32.mrf.mxu1 }
 0x4f3   :  { %v3758_v42 = vpop.f32.mrf.mxu0 }
 0x4f4   :  { %v3759_v63 = vadd.f32 %v3758_v42, %v3685_v18  ;;  %v4143_v13 = vpop.f32.mrf.mxu1 }
 0x4f5   :  { %v7714_v49 = vpop.f32.mrf.mxu0 }
 0x4f6   :  { %v7739_v26 = vpop.f32.mrf.mxu1  ;;  %v3833_v31 = vadd.f32 %v3832_v45, %v3759_v63 }
 0x4f7   :  { %v3906_v62 = vpop.f32.mrf.mxu0 }
 0x4f8   :  { %v3907_v35 = vadd.f32 %v3906_v62, %v3833_v31 }
 0x4f9   :  { %v4291_v21 = vpop.f32.mrf.mxu1  ;;  %v7724_v7 = vpop.f32.mrf.mxu0 }
 0x4fa   :  { %v3979_v56 = vadd.f32 %v3978_v43, %v3907_v35 }
 0x4fb   :  { %v7749_v24 = vpop.f32.mrf.mxu1  ;;  %v4067_v46 = vpop.f32.mrf.mxu0 }
 0x4fc   :  { %3983 = vrot.lane.b32.xlu1 %v3979_v56, %s8040_s11  ;;  %v4144_v41 = vadd.f32 %v4143_v13, %v4067_v46 }
 0x4fd   :  { %v4437_v0 = vpop.f32.mrf.mxu1  ;;  %v7734_v28 = vpop.f32.mrf.mxu0 }
 0x4ff   :  { %v7759_v11 = vpop.f32.mrf.mxu1  ;;  %v4217_v12 = vpop.f32.mrf.mxu0 }
 0x500   :  { %v4218_v8 = vadd.f32 %v4217_v12, %v4144_v41 }
 0x501   :  { %v4602_v22 = vpop.f32.mrf.mxu1  ;;  %v7744_v29 = vpop.f32.mrf.mxu0 }
 0x502   :  { %v4292_v60 = vadd.f32 %v4291_v21, %v4218_v8 }
 0x503   :  { %v7769_v57 = vpop.f32.mrf.mxu1  ;;  %v4365_v36 = vpop.f32.mrf.mxu0 }
 0x504   :  { %v4366_v38 = vadd.f32 %v4365_v36, %v4292_v60 }
 0x505   :  { %v4750_v32 = vpop.f32.mrf.mxu1  ;;  %v7754_v53 = vpop.f32.mrf.mxu0 }
 0x506   :  { %v4438_v20 = vadd.f32 %v4437_v0, %v4366_v38 }
 0x507   :  { %v7779_v61 = vpop.f32.mrf.mxu1  ;;  %v4526_v47 = vpop.f32.mrf.mxu0 }
 0x508   :  { %4442 = vrot.lane.b32.xlu0 %v4438_v20, %s8040_s11  ;;  %v4603_v44 = vadd.f32 %v4602_v22, %v4526_v47 }
 0x509   :  { %v4896_v25 = vpop.f32.mrf.mxu1  ;;  %v7764_v19 = vpop.f32.mrf.mxu0 }
 0x50b   :  { %v7789_v59 = vpop.f32.mrf.mxu1  ;;  %v4676_v3 = vpop.f32.mrf.mxu0 }
 0x50c   :  { %v4677_v5 = vadd.f32 %v4676_v3, %v4603_v44 }
 0x50d   :  { %v5061_v16 = vpop.f32.mrf.mxu1  ;;  %v7774_v54 = vpop.f32.mrf.mxu0 }
 0x50e   :  { %v4751_v55 = vadd.f32 %v4750_v32, %v4677_v5 }
 0x50f   :  { %v7799_v37 = vpop.f32.mrf.mxu1  ;;  %v4824_v52 = vpop.f32.mrf.mxu0 }
 0x510   :  { %v4825_v40 = vadd.f32 %v4824_v52, %v4751_v55 }
 0x511   :  { %v5209_v33 = vpop.f32.mrf.mxu1  ;;  %v7784_v39 = vpop.f32.mrf.mxu0 }
 0x512   :  { %v4897_v15 = vadd.f32 %v4896_v25, %v4825_v40 }
 0x513   :  { %v7809_v9 = vpop.f32.mrf.mxu1  ;;  %v4985_v10 = vpop.f32.mrf.mxu0 }
 0x514   :  { %4901 = vrot.lane.b32.xlu1 %v4897_v15, %s8040_s11  ;;  %v5062_v6 = vadd.f32 %v5061_v16, %v4985_v10 }
 0x515   :  { %v5355_v48 = vpop.f32.mrf.mxu1  ;;  %v7794_v51 = vpop.f32.mrf.mxu0 }
 0x517   :  { %v7819_v34 = vpop.f32.mrf.mxu1  ;;  %v5135_v14 = vpop.f32.mrf.mxu0 }
 0x518   :  { %v5136_v4 = vadd.f32 %v5135_v14, %v5062_v6 }
 0x519   :  { %v5520_v17 = vpop.f32.mrf.mxu1  ;;  %v7804_v27 = vpop.f32.mrf.mxu0 }
 0x51a   :  { %v5210_v30 = vadd.f32 %v5209_v33, %v5136_v4 }
 0x51b   :  { %v7829_v45 = vpop.f32.mrf.mxu1  ;;  %v5283_v58 = vpop.f32.mrf.mxu0 }
 0x51c   :  { %v5284_v1 = vadd.f32 %v5283_v58, %v5210_v30 }
 0x51d   :  { %v5668_v43 = vpop.f32.mrf.mxu1  ;;  %v7814_v2 = vpop.f32.mrf.mxu0 }
 0x51e   :  { %v5356_v23 = vadd.f32 %v5355_v48, %v5284_v1 }
 0x51f   :  { %v7839_v18 = vpop.f32.mrf.mxu1  ;;  %v5444_v42 = vpop.f32.mrf.mxu0 }
 0x520   :  { %5360 = vrot.lane.b32.xlu0 %v5356_v23, %s8040_s11  ;;  %v5521_v49 = vadd.f32 %v5520_v17, %v5444_v42 }
 0x521   :  { %v5814_v63 = vpop.f32.mrf.mxu1  ;;  %v7824_v13 = vpop.f32.mrf.mxu0 }
 0x523   :  { %v7849_v26 = vpop.f32.mrf.mxu1  ;;  %v5594_v31 = vpop.f32.mrf.mxu0 }
 0x524   :  { %v5595_v62 = vadd.f32 %v5594_v31, %v5521_v49 }
 0x525   :  { %v5979_v35 = vpop.f32.mrf.mxu1  ;;  %v7834_v21 = vpop.f32.mrf.mxu0 }
 0x526   :  { %v5669_v7 = vadd.f32 %v5668_v43, %v5595_v62 }
 0x527   :  { %v7859_v56 = vpop.f32.mrf.mxu1  ;;  %v5742_v24 = vpop.f32.mrf.mxu0 }
 0x528   :  { %v5743_v46 = vadd.f32 %v5742_v24, %v5669_v7 }
 0x529   :  { %v6127_v0 = vpop.f32.mrf.mxu1  ;;  %v7844_v28 = vpop.f32.mrf.mxu0 }
 0x52a   :  { %v5815_v41 = vadd.f32 %v5814_v63, %v5743_v46 }
 0x52b   :  { %v7869_v11 = vpop.f32.mrf.mxu1  ;;  %v5903_v12 = vpop.f32.mrf.mxu0 }
 0x52c   :  { %5819 = vrot.lane.b32.xlu1 %v5815_v41, %s8040_s11  ;;  %v5980_v29 = vadd.f32 %v5979_v35, %v5903_v12 }
 0x52d   :  { %v6273_v8 = vpop.f32.mrf.mxu1  ;;  %v7854_v22 = vpop.f32.mrf.mxu0 }
 0x52f   :  { %v7879_v60 = vpop.f32.mrf.mxu1  ;;  %v6053_v57 = vpop.f32.mrf.mxu0 }
 0x530   :  { %v6054_v36 = vadd.f32 %v6053_v57, %v5980_v29 }
 0x531   :  { %v6438_v38 = vpop.f32.mrf.mxu1  ;;  %v7864_v32 = vpop.f32.mrf.mxu0 }
 0x532   :  { %v6128_v53 = vadd.f32 %v6127_v0, %v6054_v36 }
 0x533   :  { %v7889_v20 = vpop.f32.mrf.mxu1  ;;  %v6201_v61 = vpop.f32.mrf.mxu0 }
 0x534   :  { %v6202_v47 = vadd.f32 %v6201_v61, %v6128_v53 }
 0x535   :  { %v6586_v25 = vpop.f32.mrf.mxu1  ;;  %v7874_v19 = vpop.f32.mrf.mxu0 }
 0x536   :  { %v6274_v44 = vadd.f32 %v6273_v8, %v6202_v47 }
 0x537   :  { %v7899_v59 = vpop.f32.mrf.mxu1  ;;  %v6362_v3 = vpop.f32.mrf.mxu0 }
 0x538   :  { %6278 = vrot.lane.b32.xlu0 %v6274_v44, %s8040_s11  ;;  %v6439_v54 = vadd.f32 %v6438_v38, %v6362_v3 }
 0x539   :  { %v6732_v5 = vpop.f32.mrf.mxu1  ;;  %v7884_v16 = vpop.f32.mrf.mxu0 }
 0x53b   :  { %v7909_v55 = vpop.f32.mrf.mxu1  ;;  %v6512_v37 = vpop.f32.mrf.mxu0 }
 0x53c   :  { %v6513_v52 = vadd.f32 %v6512_v37, %v6439_v54 }
 0x53d   :  { %v6897_v40 = vpop.f32.mrf.mxu1  ;;  %v7894_v33 = vpop.f32.mrf.mxu0 }
 0x53e   :  { %v6587_v39 = vadd.f32 %v6586_v25, %v6513_v52 }
 0x53f   :  { %v7919_v15 = vpop.f32.mrf.mxu1  ;;  %v6660_v9 = vpop.f32.mrf.mxu0 }
 0x540   :  { %v6661_v10 = vadd.f32 %v6660_v9, %v6587_v39 }
 0x541   :  { %v7045_v48 = vpop.f32.mrf.mxu1  ;;  %v7904_v51 = vpop.f32.mrf.mxu0 }
 0x542   :  { %v6733_v6 = vadd.f32 %v6732_v5, %v6661_v10 }
 0x543   :  { %v7929_v34 = vpop.f32.mrf.mxu1  ;;  %v6821_v14 = vpop.f32.mrf.mxu0 }
 0x544   :  { %6737 = vrot.lane.b32.xlu1 %v6733_v6, %s8040_s11  ;;  %v6898_v27 = vadd.f32 %v6897_v40, %v6821_v14 }
 0x545   :  { %v7191_v4 = vpop.f32.mrf.mxu1  ;;  %v7914_v17 = vpop.f32.mrf.mxu0 }
 0x547   :  { %v7939_v30 = vpop.f32.mrf.mxu1  ;;  %v6971_v45 = vpop.f32.mrf.mxu0 }
 0x548   :  { %v6972_v58 = vadd.f32 %v6971_v45, %v6898_v27 }
 0x549   :  { %v7924_v1 = vpop.f32.mrf.mxu0 }
 0x54a   :  { %v7046_v43 = vadd.f32 %v7045_v48, %v6972_v58 }
 0x54b   :  { %v7119_v2 = vpop.f32.mrf.mxu0 }
 0x54c   :  { %v7120_v23 = vadd.f32 %v7119_v2, %v7046_v43 }
 0x54d   :  { %v7934_v18 = vpop.f32.mrf.mxu0 }
 0x54e   :  { %v7192_v42 = vadd.f32 %v7191_v4, %v7120_v23 }
 0x550   :  { %7196 = vrot.lane.b32.xlu0 %v7192_v42, %s8040_s11 }
 0x56e   :  { %v3984_v63 = vpop.permute.xlu1 %3983 }
 0x56f   :  { %v3986_v49 = vadd.f32 %v3984_v63, %v9338_v50 }
 0x57a   :  { %v4443_v13 = vpop.permute.xlu0 %4442 }
 0x57b   :  { %v4445_v31 = vadd.f32 %v4443_v13, %v3986_v49 }
 0x586   :  { %v4902_v26 = vpop.permute.xlu1 %4901 }
 0x587   :  { %v4904_v35 = vadd.f32 %v4902_v26, %v4445_v31 }
 0x592   :  { %v5361_v62 = vpop.permute.xlu0 %5360 }
 0x593   :  { %v5363_v7 = vadd.f32 %v5361_v62, %v4904_v35 }
 0x59e   :  { %v5820_v21 = vpop.permute.xlu1 %5819 }
 0x59f   :  { %v5822_v24 = vadd.f32 %v5820_v21, %v5363_v7 }
 0x5aa   :  { %v6279_v56 = vpop.permute.xlu0 %6278 }
 0x5ab   :  { %v6281_v0 = vadd.f32 %v6279_v56, %v5822_v24 }
 0x5b6   :  { %v6738_v46 = vpop.permute.xlu1 %6737 }
 0x5b7   :  { %v6740_v28 = vadd.f32 %v6738_v46, %v6281_v0 }
 0x5c2   :  { %v7197_v41 = vpop.permute.xlu0 %7196 }
 0x5c3   :  { %v7199_v11 = vadd.f32 %v7197_v41, %v6740_v28 }
 0x5c5   :  { %7201 = vrot.lane.b32.xlu1 %v7199_v11, %s8041_s12 }
 0x637   :  { %v7202_v50 = vpop.permute.xlu1 %7201 }
 0x638   :  { %7205 = vst.msk [vmem:[#allocation7] sm:$0xff] %vm7204_vm4, %v7202_v50 }
 0x639   :  { %8016 = shalt.err (!%p8013_p0)
}
 0x63a   :  { %7215 = dma.vmem_to_hbm [thread:$0]  %s7213_s26, 128, %s9650_s3, [#allocation4]  }
 0x63b   :  { %8029 = dma.done.wait [#allocation4], 128  }
 0x63c   :  { %8030 = vsyncadd [#allocation4], 4294967168 }
 0x63d   :  { %7223 = vsyncpa [#allocation3], 1 }
 0x63e   :  { %7224 = vsyncpa [#allocation6], 1 }
 0x63f   :  { %7225 = vsyncpa [#allocation4], 1 }

</bundles_post_ra>
